<compile_context>
chip_gen: v5e
topology: v5e:2x2
jax: 0.10.0
libtpu: 0.0.40
codegen_flags: <defaults>
</compile_context>

<pallas_src>
import jax
import jax.numpy as jnp
from jax.experimental import pallas as pl
from jax.experimental.pallas import tpu as pltpu

N = 2            # batch
L_IN = 268       # input length, chosen so conv3 output = 256 = 2 * 128
C1, K1 = 16, 7
C2, K2 = 32, 5
C3, K3 = 64, 3
L1 = L_IN - (K1 - 1)     # 262
L2 = L1 - (K2 - 1)       # 258
L3 = L2 - (K3 - 1)       # 256
POOL_OUT = 128           # AdaptiveMaxPool1d(128); L3 % 128 == 0 -> window=stride=2
POOL_F = L3 // POOL_OUT  # 2
NB = C1 + C2 + C3 + 1    # concatenated bias length (conv1/2/3 folded + fc bias)


def convnet_kernel(x_ref, w1_ref, w2_ref, w3_ref, wfc_ref, b_ref, out_ref,
                   x2_s, x3_s):
    b1 = b_ref[0:C1]                        # (C1, 1)  BN+conv-bias folded
    b2 = b_ref[C1:C1 + C2]                  # (C2, 1)
    b3 = b_ref[C1 + C2:C1 + C2 + C3]        # (C3, 1)
    bfc = b_ref[NB - 1:NB]                  # (1, 1)   fc bias

    w1 = w1_ref[...]                        # (K1, C1, 1), BN-scaled, f32 (VPU)

    # ---- conv1 (1->16, k=7) + folded BN + ReLU, per sample (C_in == 1: pure
    # VPU broadcast outer-products, no degenerate contraction-1 MXU pushes).
    # The K2 lane-shifted slabs are stored straight into the conv2 im2col
    # scratch (bf16), one pass, lane-stacking the two samples side by side.
    for n in range(N):
        xn = x_ref[n]                                        # (1, L_IN)
        h1 = w1[0] * xn[:, 0:L1]
        for k in range(1, K1):
            h1 = h1 + w1[k] * xn[:, k:k + L1]
        h1 = jnp.maximum(h1 + b1, 0.0).astype(jnp.bfloat16)  # (C1, L1)
        for k in range(K2):
            x2_s[k * C1:(k + 1) * C1, n * L2:(n + 1) * L2] = h1[:, k:k + L2]

    # ---- conv2 (16->32, k=5): ONE wide MXU matmul, contraction K2*C1 = 80,
    # N-dim = 2*258 (both samples).  bf16 operands, f32 accumulate.
    h2 = jnp.dot(w2_ref[...], x2_s[...], preferred_element_type=jnp.float32)
    h2 = jnp.maximum(h2 + b2, 0.0).astype(jnp.bfloat16)      # (C2, N*L2)

    # ---- conv3 im2col scratch, single pass (sublane offsets 32k).
    for n in range(N):
        for k in range(K3):
            x3_s[k * C2:(k + 1) * C2, n * L3:(n + 1) * L3] = \
                h2[:, n * L2 + k:n * L2 + k + L3]

    # ---- conv3 (32->64, k=3): ONE wide MXU matmul, contraction K3*C2 = 96.
    h3 = jnp.dot(w3_ref[...], x3_s[...], preferred_element_type=jnp.float32)
    h3 = jnp.maximum(h3 + b3, 0.0)                           # (C3, N*L3) f32

    # ---- AdaptiveMaxPool1d(128) (window=stride=2) fused with fc: adjacent-
    # pair max, multiply by fc weight pre-scattered onto even lanes, single
    # fused reduction per sample.  post-pool F.relu is a no-op (h3 >= 0).
    wl = wfc_ref[...]                                        # (C3, L3-1) f32
    outs = []
    for n in range(N):
        h3n = h3[:, n * L3:(n + 1) * L3]                     # (C3, L3), lane-aligned
        hm = jnp.maximum(h3n[:, :L3 - 1], h3n[:, 1:])        # (C3, L3-1)
        outs.append(jnp.sum(hm * wl, axis=(0, 1), keepdims=True))   # (1, 1)
    out_ref[...] = jnp.concatenate(outs, axis=1) + bfc       # one (1, N) store


def fold_params(p):
    """Host-side one-time prep: fold BN scale/bias + conv bias, build bf16
    im2col weight matrices, scatter fc weight onto even lanes, concat biases."""
    def fold(w, cb, bn):
        gamma, beta, mean, var = bn
        scale = gamma / jnp.sqrt(var + 1e-5)                 # (c, 1)
        wf = w * scale[None]                                 # (K, cout, cin)
        bf = beta + scale * (cb - mean)                      # (c, 1)
        return wf, bf

    w1f, b1f = fold(p['w1'], p['cb1'], p['bn1'])
    w2f, b2f = fold(p['w2'], p['cb2'], p['bn2'])
    w3f, b3f = fold(p['w3'], p['cb3'], p['bn3'])
    w2m = w2f.transpose(1, 0, 2).reshape(C2, K2 * C1).astype(jnp.bfloat16)
    w3m = w3f.transpose(1, 0, 2).reshape(C3, K3 * C2).astype(jnp.bfloat16)
    wfc_lane = jnp.zeros((C3, L3 - 1), jnp.float32).at[:, 0::POOL_F].set(p['wfc'])
    bcat = jnp.concatenate([b1f, b2f, b3f, p['bfc']], axis=0)   # (NB, 1)
    return (w1f, w2m, w3m, wfc_lane, bcat)


@jax.jit
def convnet_pallas(x, kparams):
    (w1f, w2m, w3m, wfc_lane, bcat) = kparams
    out = pl.pallas_call(
        convnet_kernel,
        out_shape=jax.ShapeDtypeStruct((1, N), jnp.float32),
        grid=(1,),
        in_specs=[
            pl.BlockSpec((N, 1, L_IN), lambda i: (0, 0, 0)),     # x, whole batch
            pl.BlockSpec((K1, C1, 1), lambda i: (0, 0, 0)),      # conv1 weights
            pl.BlockSpec((C2, K2 * C1), lambda i: (0, 0)),       # conv2 im2col W (bf16)
            pl.BlockSpec((C3, K3 * C2), lambda i: (0, 0)),       # conv3 im2col W (bf16)
            pl.BlockSpec((C3, L3 - 1), lambda i: (0, 0)),        # fc W on even lanes
            pl.BlockSpec((NB, 1), lambda i: (0, 0)),             # all folded biases
        ],
        out_specs=pl.BlockSpec((1, N), lambda i: (0, 0)),
        scratch_shapes=[
            pltpu.VMEM((K2 * C1, N * L2), jnp.bfloat16),         # conv2 im2col RHS
            pltpu.VMEM((K3 * C2, N * L3), jnp.bfloat16),         # conv3 im2col RHS
        ],
    )(x, w1f, w2m, w3m, wfc_lane, bcat)
    return out.reshape(N, 1)


def init_params(key):
    ks = jax.random.split(key, 19)

    def conv(kw, kb, K, cout, cin):
        w = (jax.random.normal(kw, (K, cout, cin), jnp.float32)
             / jnp.sqrt(float(cin * K)))
        b = 0.1 * jax.random.normal(kb, (cout, 1), jnp.float32)
        return w, b

    def bn(kg, kb, km, kv, c):
        gamma = 1.0 + 0.1 * jax.random.normal(kg, (c, 1), jnp.float32)
        beta = 0.1 * jax.random.normal(kb, (c, 1), jnp.float32)
        mean = 0.1 * jax.random.normal(km, (c, 1), jnp.float32)
        var = jax.random.uniform(kv, (c, 1), jnp.float32, 0.5, 1.5)
        return (gamma, beta, mean, var)

    w1, cb1 = conv(ks[0], ks[1], K1, C1, 1)
    bn1 = bn(ks[2], ks[3], ks[4], ks[5], C1)
    w2, cb2 = conv(ks[6], ks[7], K2, C2, C1)
    bn2 = bn(ks[8], ks[9], ks[10], ks[11], C2)
    w3, cb3 = conv(ks[12], ks[13], K3, C3, C2)
    bn3 = bn(ks[14], ks[15], ks[16], ks[17], C3)
    wfc = jax.random.normal(ks[18], (C3, POOL_OUT), jnp.float32) / jnp.sqrt(8192.0)
    bfc = jnp.full((1, 1), 0.05, jnp.float32)
    return dict(w1=w1, cb1=cb1, bn1=bn1, w2=w2, cb2=cb2, bn2=bn2,
                w3=w3, cb3=cb3, bn3=bn3, wfc=wfc, bfc=bfc)


def convnet_reference(x, p):
    """Pure-JAX f32 reference using the UNFOLDED params (conv bias + eval-mode
    BN), independently checking the host-side folding / im2col repacking."""
    def conv_bn_relu(h, w, cb, bn):
        gamma, beta, mean, var = bn
        K = w.shape[0]
        Lout = h.shape[-1] - K + 1
        z = sum(jnp.einsum('oc,ncl->nol', w[k], h[:, :, k:k + Lout])
                for k in range(K)) + cb[None]
        z = (z - mean[None]) * (gamma[None] / jnp.sqrt(var[None] + 1e-5)) + beta[None]
        return jnp.maximum(z, 0.0)

    h = conv_bn_relu(x, p['w1'], p['cb1'], p['bn1'])
    h = conv_bn_relu(h, p['w2'], p['cb2'], p['bn2'])
    h = conv_bn_relu(h, p['w3'], p['cb3'], p['bn3'])
    h = h.reshape(N, C3, POOL_OUT, POOL_F).max(axis=-1)      # AdaptiveMaxPool1d(128)
    h = jnp.maximum(h, 0.0)
    flat = h.reshape(N, -1)                                  # == torch .view(N, -1)
    return flat @ p['wfc'].reshape(1, -1).T + p['bfc'][0, 0]


if __name__ == "__main__":
    key = jax.random.PRNGKey(0)
    kx, kp = jax.random.split(key)
    x = jax.random.normal(kx, (N, 1, L_IN), jnp.float32)
    params = init_params(kp)
    kparams = fold_params(params)                 # one-time host-side prep

    out = convnet_pallas(x, kparams)
    out = jax.block_until_ready(out)

    ref = convnet_reference(x, params)
    assert out.shape == (N, 1), out.shape
    # bf16 MXU operands (f32 accumulate) -> loosened tolerance vs. f32 reference.
    assert jnp.allclose(out, ref, rtol=2e-2, atol=5e-2), (out, ref)
    print("KERNEL_OK")
</pallas_src>

<mosaic_0001>
module attributes {stable_mosaic.version = 11 : i64} {
  func.func @convnet_kernel(%arg0: i32, %arg1: memref<2x1x268xf32, #tpu.memory_space<vmem>>, %arg2: memref<7x16x1xf32, #tpu.memory_space<vmem>>, %arg3: memref<32x80xbf16, #tpu.memory_space<vmem>>, %arg4: memref<64x96xbf16, #tpu.memory_space<vmem>>, %arg5: memref<64x255xf32, #tpu.memory_space<vmem>>, %arg6: memref<113x1xf32, #tpu.memory_space<vmem>>, %arg7: memref<1x2xf32, #tpu.memory_space<vmem>>, %arg8: memref<80x516xbf16, #tpu.memory_space<vmem>>, %arg9: memref<96x512xbf16, #tpu.memory_space<vmem>>) attributes {dimension_semantics = [#tpu.dimension_semantics<arbitrary>], iteration_bounds = array<i64: 1>, scalar_prefetch = 0 : i64, scratch_operands = 2 : i64, tpu.core_type = #tpu.core_type<tc>, window_params = [{pipeline_mode = #tpu.pipeline_mode<synchronous>, transform_indices = @transform_0, window_bounds = array<i64: 2, 1, 268>}, {pipeline_mode = #tpu.pipeline_mode<synchronous>, transform_indices = @transform_1, window_bounds = array<i64: 7, 16, 1>}, {pipeline_mode = #tpu.pipeline_mode<synchronous>, transform_indices = @transform_2, window_bounds = array<i64: 32, 80>}, {pipeline_mode = #tpu.pipeline_mode<synchronous>, transform_indices = @transform_3, window_bounds = array<i64: 64, 96>}, {pipeline_mode = #tpu.pipeline_mode<synchronous>, transform_indices = @transform_4, window_bounds = array<i64: 64, 255>}, {pipeline_mode = #tpu.pipeline_mode<synchronous>, transform_indices = @transform_5, window_bounds = array<i64: 113, 1>}, {pipeline_mode = #tpu.pipeline_mode<synchronous>, transform_indices = @transform_6, window_bounds = array<i64: 1, 2>}]} {
    %c0 = arith.constant 0 : index
    %c0_0 = arith.constant 0 : index
    %0 = vector.load %arg6[%c0, %c0_0] : memref<113x1xf32, #tpu.memory_space<vmem>>, vector<16x1xf32>
    %c16 = arith.constant 16 : index
    %c0_1 = arith.constant 0 : index
    %1 = vector.load %arg6[%c16, %c0_1] : memref<113x1xf32, #tpu.memory_space<vmem>>, vector<32x1xf32>
    %c48 = arith.constant 48 : index
    %c0_2 = arith.constant 0 : index
    %2 = vector.load %arg6[%c48, %c0_2] : memref<113x1xf32, #tpu.memory_space<vmem>>, vector<64x1xf32>
    %c112 = arith.constant 112 : index
    %c0_3 = arith.constant 0 : index
    %3 = vector.load %arg6[%c112, %c0_3] : memref<113x1xf32, #tpu.memory_space<vmem>>, vector<1x1xf32>
    %c0_4 = arith.constant 0 : index
    %c0_5 = arith.constant 0 : index
    %c0_6 = arith.constant 0 : index
    %4 = vector.load %arg2[%c0_4, %c0_5, %c0_6] : memref<7x16x1xf32, #tpu.memory_space<vmem>>, vector<7x16x1xf32>
    %c0_7 = arith.constant 0 : index
    %c0_8 = arith.constant 0 : index
    %c0_9 = arith.constant 0 : index
    %5 = vector.load %arg1[%c0_7, %c0_8, %c0_9] : memref<2x1x268xf32, #tpu.memory_space<vmem>>, vector<1x1x268xf32>
    %6 = vector.shape_cast %5 : vector<1x1x268xf32> to vector<1x268xf32>
    %7 = vector.extract_strided_slice %4 {offsets = [0, 0, 0], sizes = [1, 16, 1], strides = [1, 1, 1]} : vector<7x16x1xf32> to vector<1x16x1xf32>
    %8 = vector.shape_cast %7 : vector<1x16x1xf32> to vector<16x1xf32>
    %9 = vector.extract_strided_slice %6 {offsets = [0, 0], sizes = [1, 262], strides = [1, 1]} : vector<1x268xf32> to vector<1x262xf32>
    %10 = vector.broadcast %8 : vector<16x1xf32> to vector<16x262xf32>
    %11 = vector.broadcast %9 : vector<1x262xf32> to vector<16x262xf32>
    %12 = arith.mulf %10, %11 : vector<16x262xf32>
    %13 = vector.extract_strided_slice %4 {offsets = [1, 0, 0], sizes = [1, 16, 1], strides = [1, 1, 1]} : vector<7x16x1xf32> to vector<1x16x1xf32>
    %14 = vector.shape_cast %13 : vector<1x16x1xf32> to vector<16x1xf32>
    %15 = vector.extract_strided_slice %6 {offsets = [0, 1], sizes = [1, 262], strides = [1, 1]} : vector<1x268xf32> to vector<1x262xf32>
    %16 = vector.broadcast %14 : vector<16x1xf32> to vector<16x262xf32>
    %17 = vector.broadcast %15 : vector<1x262xf32> to vector<16x262xf32>
    %18 = arith.mulf %16, %17 : vector<16x262xf32>
    %19 = arith.addf %12, %18 : vector<16x262xf32>
    %20 = vector.extract_strided_slice %4 {offsets = [2, 0, 0], sizes = [1, 16, 1], strides = [1, 1, 1]} : vector<7x16x1xf32> to vector<1x16x1xf32>
    %21 = vector.shape_cast %20 : vector<1x16x1xf32> to vector<16x1xf32>
    %22 = vector.extract_strided_slice %6 {offsets = [0, 2], sizes = [1, 262], strides = [1, 1]} : vector<1x268xf32> to vector<1x262xf32>
    %23 = vector.broadcast %21 : vector<16x1xf32> to vector<16x262xf32>
    %24 = vector.broadcast %22 : vector<1x262xf32> to vector<16x262xf32>
    %25 = arith.mulf %23, %24 : vector<16x262xf32>
    %26 = arith.addf %19, %25 : vector<16x262xf32>
    %27 = vector.extract_strided_slice %4 {offsets = [3, 0, 0], sizes = [1, 16, 1], strides = [1, 1, 1]} : vector<7x16x1xf32> to vector<1x16x1xf32>
    %28 = vector.shape_cast %27 : vector<1x16x1xf32> to vector<16x1xf32>
    %29 = vector.extract_strided_slice %6 {offsets = [0, 3], sizes = [1, 262], strides = [1, 1]} : vector<1x268xf32> to vector<1x262xf32>
    %30 = vector.broadcast %28 : vector<16x1xf32> to vector<16x262xf32>
    %31 = vector.broadcast %29 : vector<1x262xf32> to vector<16x262xf32>
    %32 = arith.mulf %30, %31 : vector<16x262xf32>
    %33 = arith.addf %26, %32 : vector<16x262xf32>
    %34 = vector.extract_strided_slice %4 {offsets = [4, 0, 0], sizes = [1, 16, 1], strides = [1, 1, 1]} : vector<7x16x1xf32> to vector<1x16x1xf32>
    %35 = vector.shape_cast %34 : vector<1x16x1xf32> to vector<16x1xf32>
    %36 = vector.extract_strided_slice %6 {offsets = [0, 4], sizes = [1, 262], strides = [1, 1]} : vector<1x268xf32> to vector<1x262xf32>
    %37 = vector.broadcast %35 : vector<16x1xf32> to vector<16x262xf32>
    %38 = vector.broadcast %36 : vector<1x262xf32> to vector<16x262xf32>
    %39 = arith.mulf %37, %38 : vector<16x262xf32>
    %40 = arith.addf %33, %39 : vector<16x262xf32>
    %41 = vector.extract_strided_slice %4 {offsets = [5, 0, 0], sizes = [1, 16, 1], strides = [1, 1, 1]} : vector<7x16x1xf32> to vector<1x16x1xf32>
    %42 = vector.shape_cast %41 : vector<1x16x1xf32> to vector<16x1xf32>
    %43 = vector.extract_strided_slice %6 {offsets = [0, 5], sizes = [1, 262], strides = [1, 1]} : vector<1x268xf32> to vector<1x262xf32>
    %44 = vector.broadcast %42 : vector<16x1xf32> to vector<16x262xf32>
    %45 = vector.broadcast %43 : vector<1x262xf32> to vector<16x262xf32>
    %46 = arith.mulf %44, %45 : vector<16x262xf32>
    %47 = arith.addf %40, %46 : vector<16x262xf32>
    %48 = vector.extract_strided_slice %4 {offsets = [6, 0, 0], sizes = [1, 16, 1], strides = [1, 1, 1]} : vector<7x16x1xf32> to vector<1x16x1xf32>
    %49 = vector.shape_cast %48 : vector<1x16x1xf32> to vector<16x1xf32>
    %50 = vector.extract_strided_slice %6 {offsets = [0, 6], sizes = [1, 262], strides = [1, 1]} : vector<1x268xf32> to vector<1x262xf32>
    %51 = vector.broadcast %49 : vector<16x1xf32> to vector<16x262xf32>
    %52 = vector.broadcast %50 : vector<1x262xf32> to vector<16x262xf32>
    %53 = arith.mulf %51, %52 : vector<16x262xf32>
    %54 = arith.addf %47, %53 : vector<16x262xf32>
    %55 = vector.broadcast %0 : vector<16x1xf32> to vector<16x262xf32>
    %56 = arith.addf %54, %55 : vector<16x262xf32>
    %cst = arith.constant 0.000000e+00 : f32
    %57 = vector.broadcast %cst : f32 to vector<16x262xf32>
    %58 = arith.maximumf %56, %57 : vector<16x262xf32>
    %59 = arith.truncf %58 : vector<16x262xf32> to vector<16x262xbf16>
    %60 = vector.extract_strided_slice %59 {offsets = [0, 0], sizes = [16, 258], strides = [1, 1]} : vector<16x262xbf16> to vector<16x258xbf16>
    %c0_10 = arith.constant 0 : index
    %c0_11 = arith.constant 0 : index
    %61 = vector.load %arg8[%c0_10, %c0_11] : memref<80x516xbf16, #tpu.memory_space<vmem>>, vector<16x258xbf16>
    tpu.vector_store %arg8[%c0_10, %c0_11], %60 {strides = array<i32>} : memref<80x516xbf16, #tpu.memory_space<vmem>>, vector<16x258xbf16>,
    %62 = vector.extract_strided_slice %59 {offsets = [0, 1], sizes = [16, 258], strides = [1, 1]} : vector<16x262xbf16> to vector<16x258xbf16>
    %c16_12 = arith.constant 16 : index
    %c0_13 = arith.constant 0 : index
    %63 = vector.load %arg8[%c16_12, %c0_13] : memref<80x516xbf16, #tpu.memory_space<vmem>>, vector<16x258xbf16>
    tpu.vector_store %arg8[%c16_12, %c0_13], %62 {strides = array<i32>} : memref<80x516xbf16, #tpu.memory_space<vmem>>, vector<16x258xbf16>,
    %64 = vector.extract_strided_slice %59 {offsets = [0, 2], sizes = [16, 258], strides = [1, 1]} : vector<16x262xbf16> to vector<16x258xbf16>
    %c32 = arith.constant 32 : index
    %c0_14 = arith.constant 0 : index
    %65 = vector.load %arg8[%c32, %c0_14] : memref<80x516xbf16, #tpu.memory_space<vmem>>, vector<16x258xbf16>
    tpu.vector_store %arg8[%c32, %c0_14], %64 {strides = array<i32>} : memref<80x516xbf16, #tpu.memory_space<vmem>>, vector<16x258xbf16>,
    %66 = vector.extract_strided_slice %59 {offsets = [0, 3], sizes = [16, 258], strides = [1, 1]} : vector<16x262xbf16> to vector<16x258xbf16>
    %c48_15 = arith.constant 48 : index
    %c0_16 = arith.constant 0 : index
    %67 = vector.load %arg8[%c48_15, %c0_16] : memref<80x516xbf16, #tpu.memory_space<vmem>>, vector<16x258xbf16>
    tpu.vector_store %arg8[%c48_15, %c0_16], %66 {strides = array<i32>} : memref<80x516xbf16, #tpu.memory_space<vmem>>, vector<16x258xbf16>,
    %68 = vector.extract_strided_slice %59 {offsets = [0, 4], sizes = [16, 258], strides = [1, 1]} : vector<16x262xbf16> to vector<16x258xbf16>
    %c64 = arith.constant 64 : index
    %c0_17 = arith.constant 0 : index
    %69 = vector.load %arg8[%c64, %c0_17] : memref<80x516xbf16, #tpu.memory_space<vmem>>, vector<16x258xbf16>
    tpu.vector_store %arg8[%c64, %c0_17], %68 {strides = array<i32>} : memref<80x516xbf16, #tpu.memory_space<vmem>>, vector<16x258xbf16>,
    %c1 = arith.constant 1 : index
    %c0_18 = arith.constant 0 : index
    %c0_19 = arith.constant 0 : index
    %70 = vector.load %arg1[%c1, %c0_18, %c0_19] : memref<2x1x268xf32, #tpu.memory_space<vmem>>, vector<1x1x268xf32>
    %71 = vector.shape_cast %70 : vector<1x1x268xf32> to vector<1x268xf32>
    %72 = vector.extract_strided_slice %4 {offsets = [0, 0, 0], sizes = [1, 16, 1], strides = [1, 1, 1]} : vector<7x16x1xf32> to vector<1x16x1xf32>
    %73 = vector.shape_cast %72 : vector<1x16x1xf32> to vector<16x1xf32>
    %74 = vector.extract_strided_slice %71 {offsets = [0, 0], sizes = [1, 262], strides = [1, 1]} : vector<1x268xf32> to vector<1x262xf32>
    %75 = vector.broadcast %73 : vector<16x1xf32> to vector<16x262xf32>
    %76 = vector.broadcast %74 : vector<1x262xf32> to vector<16x262xf32>
    %77 = arith.mulf %75, %76 : vector<16x262xf32>
    %78 = vector.extract_strided_slice %4 {offsets = [1, 0, 0], sizes = [1, 16, 1], strides = [1, 1, 1]} : vector<7x16x1xf32> to vector<1x16x1xf32>
    %79 = vector.shape_cast %78 : vector<1x16x1xf32> to vector<16x1xf32>
    %80 = vector.extract_strided_slice %71 {offsets = [0, 1], sizes = [1, 262], strides = [1, 1]} : vector<1x268xf32> to vector<1x262xf32>
    %81 = vector.broadcast %79 : vector<16x1xf32> to vector<16x262xf32>
    %82 = vector.broadcast %80 : vector<1x262xf32> to vector<16x262xf32>
    %83 = arith.mulf %81, %82 : vector<16x262xf32>
    %84 = arith.addf %77, %83 : vector<16x262xf32>
    %85 = vector.extract_strided_slice %4 {offsets = [2, 0, 0], sizes = [1, 16, 1], strides = [1, 1, 1]} : vector<7x16x1xf32> to vector<1x16x1xf32>
    %86 = vector.shape_cast %85 : vector<1x16x1xf32> to vector<16x1xf32>
    %87 = vector.extract_strided_slice %71 {offsets = [0, 2], sizes = [1, 262], strides = [1, 1]} : vector<1x268xf32> to vector<1x262xf32>
    %88 = vector.broadcast %86 : vector<16x1xf32> to vector<16x262xf32>
    %89 = vector.broadcast %87 : vector<1x262xf32> to vector<16x262xf32>
    %90 = arith.mulf %88, %89 : vector<16x262xf32>
    %91 = arith.addf %84, %90 : vector<16x262xf32>
    %92 = vector.extract_strided_slice %4 {offsets = [3, 0, 0], sizes = [1, 16, 1], strides = [1, 1, 1]} : vector<7x16x1xf32> to vector<1x16x1xf32>
    %93 = vector.shape_cast %92 : vector<1x16x1xf32> to vector<16x1xf32>
    %94 = vector.extract_strided_slice %71 {offsets = [0, 3], sizes = [1, 262], strides = [1, 1]} : vector<1x268xf32> to vector<1x262xf32>
    %95 = vector.broadcast %93 : vector<16x1xf32> to vector<16x262xf32>
    %96 = vector.broadcast %94 : vector<1x262xf32> to vector<16x262xf32>
    %97 = arith.mulf %95, %96 : vector<16x262xf32>
    %98 = arith.addf %91, %97 : vector<16x262xf32>
    %99 = vector.extract_strided_slice %4 {offsets = [4, 0, 0], sizes = [1, 16, 1], strides = [1, 1, 1]} : vector<7x16x1xf32> to vector<1x16x1xf32>
    %100 = vector.shape_cast %99 : vector<1x16x1xf32> to vector<16x1xf32>
    %101 = vector.extract_strided_slice %71 {offsets = [0, 4], sizes = [1, 262], strides = [1, 1]} : vector<1x268xf32> to vector<1x262xf32>
    %102 = vector.broadcast %100 : vector<16x1xf32> to vector<16x262xf32>
    %103 = vector.broadcast %101 : vector<1x262xf32> to vector<16x262xf32>
    %104 = arith.mulf %102, %103 : vector<16x262xf32>
    %105 = arith.addf %98, %104 : vector<16x262xf32>
    %106 = vector.extract_strided_slice %4 {offsets = [5, 0, 0], sizes = [1, 16, 1], strides = [1, 1, 1]} : vector<7x16x1xf32> to vector<1x16x1xf32>
    %107 = vector.shape_cast %106 : vector<1x16x1xf32> to vector<16x1xf32>
    %108 = vector.extract_strided_slice %71 {offsets = [0, 5], sizes = [1, 262], strides = [1, 1]} : vector<1x268xf32> to vector<1x262xf32>
    %109 = vector.broadcast %107 : vector<16x1xf32> to vector<16x262xf32>
    %110 = vector.broadcast %108 : vector<1x262xf32> to vector<16x262xf32>
    %111 = arith.mulf %109, %110 : vector<16x262xf32>
    %112 = arith.addf %105, %111 : vector<16x262xf32>
    %113 = vector.extract_strided_slice %4 {offsets = [6, 0, 0], sizes = [1, 16, 1], strides = [1, 1, 1]} : vector<7x16x1xf32> to vector<1x16x1xf32>
    %114 = vector.shape_cast %113 : vector<1x16x1xf32> to vector<16x1xf32>
    %115 = vector.extract_strided_slice %71 {offsets = [0, 6], sizes = [1, 262], strides = [1, 1]} : vector<1x268xf32> to vector<1x262xf32>
    %116 = vector.broadcast %114 : vector<16x1xf32> to vector<16x262xf32>
    %117 = vector.broadcast %115 : vector<1x262xf32> to vector<16x262xf32>
    %118 = arith.mulf %116, %117 : vector<16x262xf32>
    %119 = arith.addf %112, %118 : vector<16x262xf32>
    %120 = vector.broadcast %0 : vector<16x1xf32> to vector<16x262xf32>
    %121 = arith.addf %119, %120 : vector<16x262xf32>
    %cst_20 = arith.constant 0.000000e+00 : f32
    %122 = vector.broadcast %cst_20 : f32 to vector<16x262xf32>
    %123 = arith.maximumf %121, %122 : vector<16x262xf32>
    %124 = arith.truncf %123 : vector<16x262xf32> to vector<16x262xbf16>
    %125 = vector.extract_strided_slice %124 {offsets = [0, 0], sizes = [16, 258], strides = [1, 1]} : vector<16x262xbf16> to vector<16x258xbf16>
    %c0_21 = arith.constant 0 : index
    %c258 = arith.constant 258 : index
    %126 = vector.load %arg8[%c0_21, %c258] : memref<80x516xbf16, #tpu.memory_space<vmem>>, vector<16x258xbf16>
    tpu.vector_store %arg8[%c0_21, %c258], %125 {strides = array<i32>} : memref<80x516xbf16, #tpu.memory_space<vmem>>, vector<16x258xbf16>,
    %127 = vector.extract_strided_slice %124 {offsets = [0, 1], sizes = [16, 258], strides = [1, 1]} : vector<16x262xbf16> to vector<16x258xbf16>
    %c16_22 = arith.constant 16 : index
    %c258_23 = arith.constant 258 : index
    %128 = vector.load %arg8[%c16_22, %c258_23] : memref<80x516xbf16, #tpu.memory_space<vmem>>, vector<16x258xbf16>
    tpu.vector_store %arg8[%c16_22, %c258_23], %127 {strides = array<i32>} : memref<80x516xbf16, #tpu.memory_space<vmem>>, vector<16x258xbf16>,
    %129 = vector.extract_strided_slice %124 {offsets = [0, 2], sizes = [16, 258], strides = [1, 1]} : vector<16x262xbf16> to vector<16x258xbf16>
    %c32_24 = arith.constant 32 : index
    %c258_25 = arith.constant 258 : index
    %130 = vector.load %arg8[%c32_24, %c258_25] : memref<80x516xbf16, #tpu.memory_space<vmem>>, vector<16x258xbf16>
    tpu.vector_store %arg8[%c32_24, %c258_25], %129 {strides = array<i32>} : memref<80x516xbf16, #tpu.memory_space<vmem>>, vector<16x258xbf16>,
    %131 = vector.extract_strided_slice %124 {offsets = [0, 3], sizes = [16, 258], strides = [1, 1]} : vector<16x262xbf16> to vector<16x258xbf16>
    %c48_26 = arith.constant 48 : index
    %c258_27 = arith.constant 258 : index
    %132 = vector.load %arg8[%c48_26, %c258_27] : memref<80x516xbf16, #tpu.memory_space<vmem>>, vector<16x258xbf16>
    tpu.vector_store %arg8[%c48_26, %c258_27], %131 {strides = array<i32>} : memref<80x516xbf16, #tpu.memory_space<vmem>>, vector<16x258xbf16>,
    %133 = vector.extract_strided_slice %124 {offsets = [0, 4], sizes = [16, 258], strides = [1, 1]} : vector<16x262xbf16> to vector<16x258xbf16>
    %c64_28 = arith.constant 64 : index
    %c258_29 = arith.constant 258 : index
    %134 = vector.load %arg8[%c64_28, %c258_29] : memref<80x516xbf16, #tpu.memory_space<vmem>>, vector<16x258xbf16>
    tpu.vector_store %arg8[%c64_28, %c258_29], %133 {strides = array<i32>} : memref<80x516xbf16, #tpu.memory_space<vmem>>, vector<16x258xbf16>,
    %c0_30 = arith.constant 0 : index
    %c0_31 = arith.constant 0 : index
    %135 = vector.load %arg3[%c0_30, %c0_31] : memref<32x80xbf16, #tpu.memory_space<vmem>>, vector<32x80xbf16>
    %c0_32 = arith.constant 0 : index
    %c0_33 = arith.constant 0 : index
    %136 = vector.load %arg8[%c0_32, %c0_33] : memref<80x516xbf16, #tpu.memory_space<vmem>>, vector<80x516xbf16>
    %cst_34 = arith.constant dense<0.000000e+00> : vector<32x516xf32>
    %137 = tpu.matmul %135, %136, %cst_34 {dimension_numbers = #tpu.dot_dimension_numbers<[1], [0], [0], [1], [0, 0, 1, 1], [], []>} : vector<32x80xbf16>, vector<80x516xbf16>, vector<32x516xf32> -> vector<32x516xf32>
    %138 = vector.broadcast %1 : vector<32x1xf32> to vector<32x516xf32>
    %139 = arith.addf %137, %138 : vector<32x516xf32>
    %cst_35 = arith.constant 0.000000e+00 : f32
    %140 = vector.broadcast %cst_35 : f32 to vector<32x516xf32>
    %141 = arith.maximumf %139, %140 : vector<32x516xf32>
    %142 = arith.truncf %141 : vector<32x516xf32> to vector<32x516xbf16>
    %143 = vector.extract_strided_slice %142 {offsets = [0, 0], sizes = [32, 256], strides = [1, 1]} : vector<32x516xbf16> to vector<32x256xbf16>
    %c0_36 = arith.constant 0 : index
    %c0_37 = arith.constant 0 : index
    %144 = vector.load %arg9[%c0_36, %c0_37] : memref<96x512xbf16, #tpu.memory_space<vmem>>, vector<32x256xbf16>
    tpu.vector_store %arg9[%c0_36, %c0_37], %143 {strides = array<i32>} : memref<96x512xbf16, #tpu.memory_space<vmem>>, vector<32x256xbf16>,
    %145 = vector.extract_strided_slice %142 {offsets = [0, 1], sizes = [32, 256], strides = [1, 1]} : vector<32x516xbf16> to vector<32x256xbf16>
    %c32_38 = arith.constant 32 : index
    %c0_39 = arith.constant 0 : index
    %146 = vector.load %arg9[%c32_38, %c0_39] : memref<96x512xbf16, #tpu.memory_space<vmem>>, vector<32x256xbf16>
    tpu.vector_store %arg9[%c32_38, %c0_39], %145 {strides = array<i32>} : memref<96x512xbf16, #tpu.memory_space<vmem>>, vector<32x256xbf16>,
    %147 = vector.extract_strided_slice %142 {offsets = [0, 2], sizes = [32, 256], strides = [1, 1]} : vector<32x516xbf16> to vector<32x256xbf16>
    %c64_40 = arith.constant 64 : index
    %c0_41 = arith.constant 0 : index
    %148 = vector.load %arg9[%c64_40, %c0_41] : memref<96x512xbf16, #tpu.memory_space<vmem>>, vector<32x256xbf16>
    tpu.vector_store %arg9[%c64_40, %c0_41], %147 {strides = array<i32>} : memref<96x512xbf16, #tpu.memory_space<vmem>>, vector<32x256xbf16>,
    %149 = vector.extract_strided_slice %142 {offsets = [0, 258], sizes = [32, 256], strides = [1, 1]} : vector<32x516xbf16> to vector<32x256xbf16>
    %c0_42 = arith.constant 0 : index
    %c256 = arith.constant 256 : index
    %150 = vector.load %arg9[%c0_42, %c256] : memref<96x512xbf16, #tpu.memory_space<vmem>>, vector<32x256xbf16>
    tpu.vector_store %arg9[%c0_42, %c256], %149 {strides = array<i32>} : memref<96x512xbf16, #tpu.memory_space<vmem>>, vector<32x256xbf16>,
    %151 = vector.extract_strided_slice %142 {offsets = [0, 259], sizes = [32, 256], strides = [1, 1]} : vector<32x516xbf16> to vector<32x256xbf16>
    %c32_43 = arith.constant 32 : index
    %c256_44 = arith.constant 256 : index
    %152 = vector.load %arg9[%c32_43, %c256_44] : memref<96x512xbf16, #tpu.memory_space<vmem>>, vector<32x256xbf16>
    tpu.vector_store %arg9[%c32_43, %c256_44], %151 {strides = array<i32>} : memref<96x512xbf16, #tpu.memory_space<vmem>>, vector<32x256xbf16>,
    %153 = vector.extract_strided_slice %142 {offsets = [0, 260], sizes = [32, 256], strides = [1, 1]} : vector<32x516xbf16> to vector<32x256xbf16>
    %c64_45 = arith.constant 64 : index
    %c256_46 = arith.constant 256 : index
    %154 = vector.load %arg9[%c64_45, %c256_46] : memref<96x512xbf16, #tpu.memory_space<vmem>>, vector<32x256xbf16>
    tpu.vector_store %arg9[%c64_45, %c256_46], %153 {strides = array<i32>} : memref<96x512xbf16, #tpu.memory_space<vmem>>, vector<32x256xbf16>,
    %c0_47 = arith.constant 0 : index
    %c0_48 = arith.constant 0 : index
    %155 = vector.load %arg4[%c0_47, %c0_48] : memref<64x96xbf16, #tpu.memory_space<vmem>>, vector<64x96xbf16>
    %c0_49 = arith.constant 0 : index
    %c0_50 = arith.constant 0 : index
    %156 = vector.load %arg9[%c0_49, %c0_50] : memref<96x512xbf16, #tpu.memory_space<vmem>>, vector<96x512xbf16>
    %cst_51 = arith.constant dense<0.000000e+00> : vector<64x512xf32>
    %157 = tpu.matmul %155, %156, %cst_51 {dimension_numbers = #tpu.dot_dimension_numbers<[1], [0], [0], [1], [0, 0, 1, 1], [], []>} : vector<64x96xbf16>, vector<96x512xbf16>, vector<64x512xf32> -> vector<64x512xf32>
    %158 = vector.broadcast %2 : vector<64x1xf32> to vector<64x512xf32>
    %159 = arith.addf %157, %158 : vector<64x512xf32>
    %cst_52 = arith.constant 0.000000e+00 : f32
    %160 = vector.broadcast %cst_52 : f32 to vector<64x512xf32>
    %161 = arith.maximumf %159, %160 : vector<64x512xf32>
    %c0_53 = arith.constant 0 : index
    %c0_54 = arith.constant 0 : index
    %162 = vector.load %arg5[%c0_53, %c0_54] : memref<64x255xf32, #tpu.memory_space<vmem>>, vector<64x255xf32>
    %163 = vector.extract_strided_slice %161 {offsets = [0, 0], sizes = [64, 256], strides = [1, 1]} : vector<64x512xf32> to vector<64x256xf32>
    %164 = vector.extract_strided_slice %163 {offsets = [0, 0], sizes = [64, 255], strides = [1, 1]} : vector<64x256xf32> to vector<64x255xf32>
    %165 = vector.extract_strided_slice %163 {offsets = [0, 1], sizes = [64, 255], strides = [1, 1]} : vector<64x256xf32> to vector<64x255xf32>
    %166 = arith.maximumf %164, %165 : vector<64x255xf32>
    %167 = arith.mulf %166, %162 : vector<64x255xf32>
    %168 = vector.shape_cast %167 : vector<64x255xf32> to vector<1x64x255xf32>
    %cst_55 = arith.constant dense<0.000000e+00> : vector<1xf32>
    %169 = vector.multi_reduction <add>, %168, %cst_55 [1, 2] : vector<1x64x255xf32> to vector<1xf32>
    %170 = vector.shape_cast %169 : vector<1xf32> to vector<1x1x1xf32>
    %171 = vector.extract %170[0, 0, 0] : f32 from vector<1x1x1xf32>
    %172 = vector.broadcast %171 : f32 to vector<1x1xf32>
    %173 = vector.extract_strided_slice %161 {offsets = [0, 256], sizes = [64, 256], strides = [1, 1]} : vector<64x512xf32> to vector<64x256xf32>
    %174 = vector.extract_strided_slice %173 {offsets = [0, 0], sizes = [64, 255], strides = [1, 1]} : vector<64x256xf32> to vector<64x255xf32>
    %175 = vector.extract_strided_slice %173 {offsets = [0, 1], sizes = [64, 255], strides = [1, 1]} : vector<64x256xf32> to vector<64x255xf32>
    %176 = arith.maximumf %174, %175 : vector<64x255xf32>
    %177 = arith.mulf %176, %162 : vector<64x255xf32>
    %178 = vector.shape_cast %177 : vector<64x255xf32> to vector<1x64x255xf32>
    %cst_56 = arith.constant dense<0.000000e+00> : vector<1xf32>
    %179 = vector.multi_reduction <add>, %178, %cst_56 [1, 2] : vector<1x64x255xf32> to vector<1xf32>
    %180 = vector.shape_cast %179 : vector<1xf32> to vector<1x1x1xf32>
    %181 = vector.extract %180[0, 0, 0] : f32 from vector<1x1x1xf32>
    %182 = vector.broadcast %181 : f32 to vector<1x1xf32>
    %183 = tpu.concatenate %172, %182 in 1 : vector<1x1xf32>, vector<1x1xf32> -> vector<1x2xf32>
    %184 = vector.broadcast %3 : vector<1x1xf32> to vector<1x2xf32>
    %185 = arith.addf %183, %184 : vector<1x2xf32>
    %c0_57 = arith.constant 0 : index
    %c0_58 = arith.constant 0 : index
    %186 = vector.load %arg7[%c0_57, %c0_58] : memref<1x2xf32, #tpu.memory_space<vmem>>, vector<1x2xf32>
    tpu.vector_store %arg7[%c0_57, %c0_58], %185 {strides = array<i32>} : memref<1x2xf32, #tpu.memory_space<vmem>>, vector<1x2xf32>,
    return
  }
  func.func @transform_0(%arg0: i32) -> (i32, i32, i32) {
    %c0_i32 = arith.constant 0 : i32
    %c0_i32_0 = arith.constant 0 : i32
    %c0_i32_1 = arith.constant 0 : i32
    %c0_i32_2 = arith.constant 0 : i32
    return %c0_i32, %c0_i32_0, %c0_i32_1 : i32, i32, i32
  }
  func.func @transform_1(%arg0: i32) -> (i32, i32, i32) {
    %c0_i32 = arith.constant 0 : i32
    %c0_i32_0 = arith.constant 0 : i32
    %c0_i32_1 = arith.constant 0 : i32
    %c0_i32_2 = arith.constant 0 : i32
    return %c0_i32, %c0_i32_0, %c0_i32_1 : i32, i32, i32
  }
  func.func @transform_2(%arg0: i32) -> (i32, i32) {
    %c0_i32 = arith.constant 0 : i32
    %c0_i32_0 = arith.constant 0 : i32
    %c0_i32_1 = arith.constant 0 : i32
    return %c0_i32, %c0_i32_0 : i32, i32
  }
  func.func @transform_3(%arg0: i32) -> (i32, i32) {
    %c0_i32 = arith.constant 0 : i32
    %c0_i32_0 = arith.constant 0 : i32
    %c0_i32_1 = arith.constant 0 : i32
    return %c0_i32, %c0_i32_0 : i32, i32
  }
  func.func @transform_4(%arg0: i32) -> (i32, i32) {
    %c0_i32 = arith.constant 0 : i32
    %c0_i32_0 = arith.constant 0 : i32
    %c0_i32_1 = arith.constant 0 : i32
    return %c0_i32, %c0_i32_0 : i32, i32
  }
  func.func @transform_5(%arg0: i32) -> (i32, i32) {
    %c0_i32 = arith.constant 0 : i32
    %c0_i32_0 = arith.constant 0 : i32
    %c0_i32_1 = arith.constant 0 : i32
    return %c0_i32, %c0_i32_0 : i32, i32
  }
  func.func @transform_6(%arg0: i32) -> (i32, i32) {
    %c0_i32 = arith.constant 0 : i32
    %c0_i32_0 = arith.constant 0 : i32
    %c0_i32_1 = arith.constant 0 : i32
    return %c0_i32, %c0_i32_0 : i32, i32
  }
}

</mosaic_0001>

<bundles_post_ra>
// kernel: convnet_pallas.1
= control target key start
LH: loop header
LB: loop body
LE: loop exit
PB: predicated region body
PF: predicated region fallthrough
CT: control target
= control target key end

     0   :  { %v2469_v2 = vmov 0   ;;  %s3853_s0 = inlined_call_operand.vmem [shape: f32[2,1,268], index: 0, kind: input, shape index: {}]   ;;  %s3854_s1 = inlined_call_operand.vmem [shape: f32[7,16,1], index: 1, kind: input, shape index: {}]   ;;  %s3855_s2 = inlined_call_operand.vmem [shape: bf16[32,80], index: 2, kind: input, shape index: {}]   ;;  %s3856_s3 = inlined_call_operand.vmem [shape: bf16[64,96], index: 3, kind: input, shape index: {}]   ;;  %s3857_s4 = inlined_call_operand.vmem [shape: f32[64,255], index: 4, kind: input, shape index: {}]   ;;  %s3858_s5 = inlined_call_operand.vmem [shape: f32[113,1], index: 5, kind: input, shape index: {}]   ;;  %s3859_s6 = inlined_call_operand.hbm [shape: f32[1,2], index: 6, kind: output, shape index: {}]  }
   0x1   :  { %v44_v0 = vld [vmem:[%s3854_s1 + $0x20] sm:$0xff]  ;;  %v42_v1 = vld [vmem:[%s3854_s1 + $0x10] sm:$0xff]  ;;  %2441 = vset.pattern.permute.xlu1 %v2469_v2  ;;  %2440 = vset.pattern.permute.xlu0 %v2469_v2 }
   0x2   :  { %131 = vperm.xlu1 %2441, %v44_v0   ;;  %80 = vperm.xlu0 %2440, %v42_v1   ;;  %v46_v3 = vld [vmem:[%s3854_s1 + $0x30] sm:$0xff] }
   0x3   :  { %2442 = vset.pattern.permute.xlu2 %v2469_v2 }
   0x4   :  { %182 = vperm.xlu2 %2442, %v46_v3  }
   0x5   :  { %11 = vsyncpa [#allocation5], 0  ;;  %v45_v4 = vld [vmem:[%s3854_s1 + $0x28] sm:$0xff]  ;;  %v43_v5 = vld [vmem:[%s3854_s1 + $0x18] sm:$0xff]  ;;  %s2471_s27 = smov 126   ;;  %s2472_s28 = smov 125  }
   0x6   :  { %v47_v6 = vld [vmem:[%s3854_s1 + $0x38] sm:$0xff]  ;;  %v49_v7 = vld [vmem:[%s3854_s1 + $0x48] sm:$0xff]  ;;  %v48_v8 = vld [vmem:[%s3854_s1 + $0x40] sm:$0xff]  ;;  %s2473_s29 = smov 124   ;;  %s2474_s30 = smov 123   ;;  %vm112_vm0 = vcmask 1039360  }
   0x7   :  { %v50_v9 = vld [vmem:[%s3854_s1 + $0x50] sm:$0xff]  ;;  %v52_v10 = vld [vmem:[%s3854_s1 + $0x60] sm:$0xff]  ;;  %v51_v11 = vld [vmem:[%s3854_s1 + $0x58] sm:$0xff]  ;;  %s2475_s7 = smov 122   ;;  %vm163_vm1 = vcmask 1031168   ;;  %vm214_vm2 = vcmask 1022976  }
   0x8   :  { %v53_v12 = vld [vmem:[%s3854_s1 + $0x68] sm:$0xff]  ;;  %v40_v14 = vld [vmem:[%s3854_s1] sm:$0xff]  ;;  %vm265_vm3 = vcmask 1014784   ;;  %vm316_vm4 = vcmask 1006592   ;;  %vm367_vm5 = vcmask 998400   ;;  %vm411_vm6 = vcmask 11264  }
   0x9   :  { %v41_v13 = vld [vmem:[%s3854_s1 + $0x8] sm:$0xff]  ;;  %v54_v15 = vld [vmem:[%s3853_s0] sm:$0x7]  ;;  %s2470_s1 = smov 127   ;;  %v2118_v3 = vld [vmem:[%s3853_s0 + $0x3] sm:$0x7] }
   0xa   :  { %136 = vperm.xlu1 %2441, %v45_v4   ;;  %85 = vperm.xlu0 %2440, %v43_v5   ;;  %v2559_v16 = vperm.slane %v54_v15, 0  ;;  %v2561_v17 = vperm.slane %v54_v15, 2  ;;  %v2563_v18 = vperm.slane %v54_v15, 1  ;;  %v2702_v5 = vperm.slane %v2118_v3, 0  ;;  %s2476_s0 = smov 2   ;;  %s2477_s14 = smov 1  }
   0xb   :  { %vm818_vm7 = vcmask 27648   ;;  %vm431_vm8 = vcmask 1043456   ;;  %vm814_vm9 = vcmask 1043472   ;;  %vm815_vm10 = vcmask 1047556   ;;  %s2478_s9 = smov [#allocation4]  }
   0xc   :  { %187 = vperm.xlu2 %2442, %v47_v6   ;;  %v25_v6 = vld [vmem:[%s3858_s5] sm:$0xff]  ;;  %vm3103_vm11 = vmor %vm815_vm10, %vm814_vm9  ;;  %vm1091_vm12 = vcmask 654336   ;;  %vm832_vm13 = vcmask 7168   ;;  %vm805_vm14 = vcmask 15360   ;;  %vm1641_vm15 = vcmask 785408  }
  0x12   :  { %238 = vperm.xlu1 %2441, %v49_v7   ;;  %233 = vperm.xlu0 %2440, %v48_v8   ;;  %v26_v8 = vld [vmem:[%s3858_s5 + $0x8] sm:$0xff] }
  0x14   :  { %284 = vperm.xlu2 %2442, %v50_v9  }
  0x1a   :  { %335 = vperm.xlu1 %2441, %v52_v10   ;;  %289 = vperm.xlu0 %2440, %v51_v11   ;;  %v2715_v10 = vperm.slane %v2118_v3, 1  ;;  %v2717_v11 = vperm.slane %v2118_v3, 2 }
  0x1c   :  { %340 = vperm.xlu2 %2442, %v53_v12  }
  0x22   :  { %62 = vperm.xlu1 %2441, %v41_v13   ;;  %57 = vperm.xlu0 %2440, %v40_v14  }
  0x5e   :  { %v2609_v35 = vpop.permute.xlu2 %182 }
  0x5f   :  { %v190_v36 = vmul.f32 %v2609_v35, %v2559_v16  ;;  %v192_v37 = vmul.f32 %v2609_v35, %v2561_v17  ;;  %v191_v38 = vmul.f32 %v2609_v35, %v2563_v18 }
  0x66   :  { %v2620_v39 = vpop.permute.xlu2 %187 }
  0x67   :  { %v193_v40 = vmul.f32 %v2620_v39, %v2559_v16  ;;  %v195_v41 = vmul.f32 %v2620_v39, %v2561_v17  ;;  %v194_v42 = vmul.f32 %v2620_v39, %v2563_v18 }
  0x6e   :  { %v2653_v51 = vpop.permute.xlu2 %284 }
  0x6f   :  { %v292_v52 = vmul.f32 %v2653_v51, %v2559_v16  ;;  %v294_v53 = vmul.f32 %v2653_v51, %v2561_v17  ;;  %v293_v54 = vmul.f32 %v2653_v51, %v2563_v18 }
  0x74   :  { %v2565_v19 = vpop.permute.xlu0 %80  ;;  %v2587_v27 = vpop.permute.xlu1 %131 }
  0x75   :  { %v88_v20 = vmul.f32 %v2565_v19, %v2559_v16  ;;  %v90_v21 = vmul.f32 %v2565_v19, %v2561_v17  ;;  %v89_v22 = vmul.f32 %v2565_v19, %v2563_v18  ;;  %v139_v28 = vmul.f32 %v2587_v27, %v2559_v16 }
  0x76   :  { %v141_v29 = vmul.f32 %v2587_v27, %v2561_v17  ;;  %v140_v30 = vmul.f32 %v2587_v27, %v2563_v18  ;;  %v2686_v63 = vpop.permute.xlu2 %340  ;;  %v535_v7 = vmul.f32 %v2702_v5, %v2565_v19  ;;  %v536_v13 = vmul.f32 %v2715_v10, %v2565_v19 }
  0x77   :  { %100 = vrot.lane.b32.xlu2 %v88_v20, %s2470_s1  ;;  %104 = vrot.lane.b32.xlu1 %v90_v21, %s2470_s1  ;;  %v346_v0 = vmul.f32 %v2686_v63, %v2559_v16  ;;  %v348_v1 = vmul.f32 %v2686_v63, %v2561_v17  ;;  %v347_v2 = vmul.f32 %v2686_v63, %v2563_v18 }
  0x78   :  { %102 = vrot.lane.b32.xlu0 %v89_v22, %s2470_s1  ;;  %v537_v14 = vmul.f32 %v2717_v11, %v2565_v19  ;;  %v575_v22 = vmul.f32 %v2702_v5, %v2587_v27 }
  0x7c   :  { %v2576_v23 = vpop.permute.xlu0 %85  ;;  %v2598_v31 = vpop.permute.xlu1 %136 }
  0x7d   :  { %v91_v24 = vmul.f32 %v2576_v23, %v2559_v16  ;;  %v93_v25 = vmul.f32 %v2576_v23, %v2561_v17  ;;  %v92_v26 = vmul.f32 %v2576_v23, %v2563_v18  ;;  %v142_v32 = vmul.f32 %v2598_v31, %v2559_v16 }
  0x7e   :  { %v144_v33 = vmul.f32 %v2598_v31, %v2561_v17  ;;  %v143_v34 = vmul.f32 %v2598_v31, %v2563_v18  ;;  %v538_v12 = vmul.f32 %v2702_v5, %v2576_v23  ;;  %v540_v19 = vmul.f32 %v2717_v11, %v2576_v23 }
  0x7f   :  { %106 = vrot.lane.b32.xlu2 %v91_v24, %s2470_s1  ;;  %110 = vrot.lane.b32.xlu1 %v93_v25, %s2470_s1  ;;  %v539_v24 = vmul.f32 %v2715_v10, %v2576_v23  ;;  %v577_v23 = vmul.f32 %v2717_v11, %v2587_v27 }
  0x80   :  { %108 = vrot.lane.b32.xlu0 %v92_v26, %s2470_s1 }
  0x84   :  { %v2631_v43 = vpop.permute.xlu0 %233  ;;  %v2642_v47 = vpop.permute.xlu1 %238 }
  0x85   :  { %v241_v44 = vmul.f32 %v2631_v43, %v2559_v16  ;;  %v243_v45 = vmul.f32 %v2631_v43, %v2561_v17  ;;  %v242_v46 = vmul.f32 %v2631_v43, %v2563_v18  ;;  %v244_v48 = vmul.f32 %v2642_v47, %v2559_v16 }
  0x86   :  { %v246_v49 = vmul.f32 %v2642_v47, %v2561_v17  ;;  %v245_v50 = vmul.f32 %v2642_v47, %v2563_v18 }
  0x87   :  { %151 = vrot.lane.b32.xlu2 %v139_v28, %s2471_s27  ;;  %155 = vrot.lane.b32.xlu1 %v141_v29, %s2471_s27  ;;  %v578_v29 = vmul.f32 %v2702_v5, %v2598_v31 }
  0x88   :  { %153 = vrot.lane.b32.xlu0 %v140_v30, %s2471_s27  ;;  %v576_v30 = vmul.f32 %v2715_v10, %v2587_v27  ;;  %v580_v27 = vmul.f32 %v2717_v11, %v2598_v31 }
  0x8c   :  { %v2664_v55 = vpop.permute.xlu0 %289  ;;  %v2675_v59 = vpop.permute.xlu1 %335 }
  0x8d   :  { %v295_v56 = vmul.f32 %v2664_v55, %v2559_v16  ;;  %v297_v57 = vmul.f32 %v2664_v55, %v2561_v17  ;;  %v296_v58 = vmul.f32 %v2664_v55, %v2563_v18  ;;  %v343_v60 = vmul.f32 %v2675_v59, %v2559_v16 }
  0x8e   :  { %v345_v61 = vmul.f32 %v2675_v59, %v2561_v17  ;;  %v344_v62 = vmul.f32 %v2675_v59, %v2563_v18 }
  0x8f   :  { %157 = vrot.lane.b32.xlu2 %v142_v32, %s2471_s27  ;;  %161 = vrot.lane.b32.xlu1 %v144_v33, %s2471_s27 }
  0x90   :  { %159 = vrot.lane.b32.xlu0 %v143_v34, %s2471_s27 }
  0x94   :  { %v2728_v15 = vpop.permute.xlu1 %62  ;;  %v2732_v21 = vpop.permute.xlu0 %57 }
  0x97   :  { %202 = vrot.lane.b32.xlu2 %v190_v36, %s2472_s28  ;;  %206 = vrot.lane.b32.xlu1 %v192_v37, %s2472_s28  ;;  %v615_v36 = vmul.f32 %v2702_v5, %v2609_v35  ;;  %v579_v37 = vmul.f32 %v2715_v10, %v2598_v31  ;;  %v617_v31 = vmul.f32 %v2717_v11, %v2609_v35 }
  0x98   :  { %204 = vrot.lane.b32.xlu0 %v191_v38, %s2472_s28 }
  0x9f   :  { %208 = vrot.lane.b32.xlu2 %v193_v40, %s2472_s28  ;;  %212 = vrot.lane.b32.xlu1 %v195_v41, %s2472_s28 }
  0xa0   :  { %210 = vrot.lane.b32.xlu0 %v194_v42, %s2472_s28  ;;  %v618_v42 = vmul.f32 %v2702_v5, %v2620_v39 }
  0xa7   :  { %253 = vrot.lane.b32.xlu2 %v241_v44, %s2473_s29  ;;  %257 = vrot.lane.b32.xlu1 %v243_v45, %s2473_s29  ;;  %v616_v44 = vmul.f32 %v2715_v10, %v2609_v35  ;;  %v620_v35 = vmul.f32 %v2717_v11, %v2620_v39 }
  0xa8   :  { %255 = vrot.lane.b32.xlu0 %v242_v46, %s2473_s29 }
  0xaf   :  { %259 = vrot.lane.b32.xlu2 %v244_v48, %s2473_s29  ;;  %263 = vrot.lane.b32.xlu1 %v246_v49, %s2473_s29  ;;  %v655_v49 = vmul.f32 %v2702_v5, %v2631_v43 }
  0xb0   :  { %261 = vrot.lane.b32.xlu0 %v245_v50, %s2473_s29  ;;  %v619_v50 = vmul.f32 %v2715_v10, %v2620_v39  ;;  %v657_v39 = vmul.f32 %v2717_v11, %v2631_v43 }
  0xb7   :  { %304 = vrot.lane.b32.xlu2 %v292_v52, %s2474_s30  ;;  %308 = vrot.lane.b32.xlu1 %v294_v53, %s2474_s30 }
  0xb8   :  { %306 = vrot.lane.b32.xlu0 %v293_v54, %s2474_s30 }
  0xbf   :  { %310 = vrot.lane.b32.xlu2 %v295_v56, %s2474_s30  ;;  %314 = vrot.lane.b32.xlu1 %v297_v57, %s2474_s30  ;;  %v658_v56 = vmul.f32 %v2702_v5, %v2642_v47  ;;  %v656_v57 = vmul.f32 %v2715_v10, %v2631_v43  ;;  %v660_v43 = vmul.f32 %v2717_v11, %v2642_v47 }
  0xc0   :  { %312 = vrot.lane.b32.xlu0 %v296_v58, %s2474_s30 }
  0xc7   :  { %355 = vrot.lane.b32.xlu2 %v343_v60, %s2475_s7  ;;  %359 = vrot.lane.b32.xlu1 %v345_v61, %s2475_s7 }
  0xc8   :  { %357 = vrot.lane.b32.xlu0 %v344_v62, %s2475_s7  ;;  %v695_v62 = vmul.f32 %v2702_v5, %v2653_v51 }
  0xcf   :  { %361 = vrot.lane.b32.xlu2 %v346_v0, %s2475_s7  ;;  %365 = vrot.lane.b32.xlu1 %v348_v1, %s2475_s7  ;;  %v659_v0 = vmul.f32 %v2715_v10, %v2642_v47 }
  0xd0   :  { %363 = vrot.lane.b32.xlu0 %v347_v2, %s2475_s7 }
  0xd1   :  { %v2700_v4 = vpop.permute.xlu2 %100 }
  0xd7   :  { %547 = vrot.lane.b32.xlu1 %v535_v7, %s2470_s1  ;;  %386 = vperm.xlu2 %2442, %v25_v6   ;;  %v698_v6 = vmul.f32 %v2702_v5, %v2664_v55  ;;  %v696_v7 = vmul.f32 %v2715_v10, %v2653_v51 }
  0xd8   :  { %391 = vperm.xlu0 %2440, %v26_v8   ;;  %v697_v8 = vmul.f32 %v2717_v11, %v2653_v51  ;;  %v700_v51 = vmul.f32 %v2717_v11, %v2664_v55 }
  0xd9   :  { %v2713_v9 = vpop.permute.xlu2 %106 }
  0xdf   :  { %553 = vrot.lane.b32.xlu1 %v538_v12, %s2470_s1  ;;  %549 = vrot.lane.b32.xlu2 %v536_v13, %s2470_s1 }
  0xe0   :  { %551 = vrot.lane.b32.xlu0 %v537_v14, %s2470_s1  ;;  %v735_v14 = vmul.f32 %v2702_v5, %v2675_v59 }
  0xe1   :  { %v2730_v20 = vpop.permute.xlu2 %151 }
  0xe7   :  { %587 = vrot.lane.b32.xlu1 %v575_v22, %s2471_s27  ;;  %555 = vrot.lane.b32.xlu2 %v539_v24, %s2470_s1  ;;  %v699_v22 = vmul.f32 %v2715_v10, %v2664_v55  ;;  %v74_v55 = vmul.f32 %v2561_v17, %v2732_v21 }
  0xe8   :  { %557 = vrot.lane.b32.xlu0 %v540_v19, %s2470_s1 }
  0xe9   :  { %v2743_v25 = vpop.permute.xlu2 %157  ;;  %v2745_v26 = vpop.permute.xlu1 %104 }
  0xea   :  { %v2747_v28 = vpop.permute.xlu0 %102 }
  0xef   :  { %593 = vrot.lane.b32.xlu1 %v578_v29, %s2471_s27  ;;  %589 = vrot.lane.b32.xlu2 %v576_v30, %s2471_s27  ;;  %v738_v30 = vmul.f32 %v2702_v5, %v2686_v63 }
  0xf0   :  { %591 = vrot.lane.b32.xlu0 %v577_v23, %s2471_s27  ;;  %v736_v23 = vmul.f32 %v2715_v10, %v2675_v59 }
  0xf1   :  { %v2758_v32 = vpop.permute.xlu2 %202  ;;  %v2760_v33 = vpop.permute.xlu1 %110 }
  0xf2   :  { %v2762_v34 = vpop.permute.xlu0 %108 }
  0xf7   :  { %627 = vrot.lane.b32.xlu1 %v615_v36, %s2472_s28  ;;  %595 = vrot.lane.b32.xlu2 %v579_v37, %s2471_s27  ;;  %v737_v36 = vmul.f32 %v2717_v11, %v2675_v59  ;;  %v113_v37 = vsel %vm112_vm0, %v2700_v4, %v2747_v28  ;;  %v73_v59 = vmul.f32 %v2563_v18, %v2732_v21 }
  0xf8   :  { %597 = vrot.lane.b32.xlu0 %v580_v27, %s2471_s27  ;;  %v114_v27 = vsel %vm112_vm0, %v2747_v28, %v2745_v26 }
  0xf9   :  { %v2773_v38 = vpop.permute.xlu2 %208  ;;  %v2775_v40 = vpop.permute.xlu1 %155 }
  0xfa   :  { %v2777_v41 = vpop.permute.xlu0 %153 }
  0xfb   :  { %v164_v4 = vsel %vm163_vm1, %v2730_v20, %v2777_v41  ;;  %v165_v28 = vsel %vm163_vm1, %v2777_v41, %v2775_v40 }
  0xff   :  { %633 = vrot.lane.b32.xlu1 %v618_v42, %s2472_s28  ;;  %629 = vrot.lane.b32.xlu2 %v616_v44, %s2472_s28  ;;  %v125_v42 = vadd.f32 %v2745_v26, %v74_v55  ;;  %v72_v44 = vmul.f32 %v2559_v16, %v2732_v21 }
 0x100   :  { %631 = vrot.lane.b32.xlu0 %v617_v31, %s2472_s28 }
 0x101   :  { %v2788_v45 = vpop.permute.xlu2 %253  ;;  %v2790_v46 = vpop.permute.xlu1 %161 }
 0x102   :  { %v2792_v48 = vpop.permute.xlu0 %159 }
 0x107   :  { %667 = vrot.lane.b32.xlu1 %v655_v49, %s2473_s29  ;;  %635 = vrot.lane.b32.xlu2 %v619_v50, %s2472_s28  ;;  %v123_v49 = vadd.f32 %v113_v37, %v72_v44  ;;  %v124_v50 = vadd.f32 %v114_v27, %v73_v59 }
 0x108   :  { %637 = vrot.lane.b32.xlu0 %v620_v35, %s2472_s28  ;;  %v176_v35 = vadd.f32 %v2775_v40, %v125_v42 }
 0x109   :  { %v2803_v52 = vpop.permute.xlu2 %259  ;;  %v2805_v53 = vpop.permute.xlu1 %206  ;;  %v174_v41 = vadd.f32 %v164_v4, %v123_v49 }
 0x10a   :  { %v2807_v54 = vpop.permute.xlu0 %204 }
 0x10b   :  { %v216_v20 = vsel %vm214_vm2, %v2807_v54, %v2805_v53 }
 0x10f   :  { %673 = vrot.lane.b32.xlu1 %v658_v56, %s2473_s29  ;;  %669 = vrot.lane.b32.xlu2 %v656_v57, %s2473_s29  ;;  %v215_v57 = vsel %vm214_vm2, %v2758_v32, %v2807_v54 }
 0x110   :  { %671 = vrot.lane.b32.xlu0 %v657_v39, %s2473_s29  ;;  %v175_v39 = vadd.f32 %v165_v28, %v124_v50 }
 0x111   :  { %v2818_v58 = vpop.permute.xlu2 %304  ;;  %v2820_v60 = vpop.permute.xlu1 %212 }
 0x112   :  { %v2822_v61 = vpop.permute.xlu0 %210 }
 0x117   :  { %707 = vrot.lane.b32.xlu1 %v695_v62, %s2474_s30  ;;  %675 = vrot.lane.b32.xlu2 %v659_v0, %s2473_s29  ;;  %v227_v62 = vadd.f32 %v2805_v53, %v176_v35 }
 0x118   :  { %677 = vrot.lane.b32.xlu0 %v660_v43, %s2473_s29  ;;  %v739_v43 = vmul.f32 %v2715_v10, %v2686_v63 }
 0x119   :  { %v2833_v1 = vpop.permute.xlu2 %310  ;;  %v258_v2 = vpop.permute.xlu1 %257 }
 0x11a   :  { %v256_v3 = vpop.permute.xlu0 %255  ;;  %v278_v32 = vadd.f32 %v258_v2, %v227_v62 }
 0x11b   :  { %v266_v0 = vsel %vm265_vm3, %v2788_v45, %v256_v3  ;;  %v267_v40 = vsel %vm265_vm3, %v256_v3, %v258_v2 }
 0x11f   :  { %713 = vrot.lane.b32.xlu1 %v698_v6, %s2474_s30  ;;  %709 = vrot.lane.b32.xlu2 %v696_v7, %s2474_s30  ;;  %v225_v6 = vadd.f32 %v215_v57, %v174_v41  ;;  %v226_v7 = vadd.f32 %v216_v20, %v175_v39 }
 0x120   :  { %711 = vrot.lane.b32.xlu0 %v697_v8, %s2474_s30  ;;  %v740_v8 = vmul.f32 %v2717_v11, %v2686_v63 }
 0x121   :  { %v2844_v47 = vpop.permute.xlu2 %355  ;;  %v2846_v12 = vpop.permute.xlu1 %263  ;;  %v277_v45 = vadd.f32 %v267_v40, %v226_v7 }
 0x122   :  { %v2848_v13 = vpop.permute.xlu0 %261 }
 0x123   :  { %v268_v62 = vsel %vm265_vm3, %v2803_v52, %v2848_v13 }
 0x127   :  { %747 = vrot.lane.b32.xlu1 %v735_v14, %s2475_s7  ;;  %715 = vrot.lane.b32.xlu2 %v699_v22, %s2474_s30  ;;  %v276_v14 = vadd.f32 %v266_v0, %v225_v6 }
 0x128   :  { %717 = vrot.lane.b32.xlu0 %v700_v51, %s2474_s30 }
 0x129   :  { %v2859_v24 = vpop.permute.xlu2 %361  ;;  %v309_v19 = vpop.permute.xlu1 %308 }
 0x12a   :  { %v307_v29 = vpop.permute.xlu0 %306  ;;  %v329_v22 = vadd.f32 %v309_v19, %v278_v32 }
 0x12b   :  { %v317_v54 = vsel %vm316_vm4, %v2818_v58, %v307_v29  ;;  %v318_v53 = vsel %vm316_vm4, %v307_v29, %v309_v19  ;;  %v77_v58 = vmul.f32 %v2561_v17, %v2728_v15  ;;  %v115_v29 = vsel %vm112_vm0, %v2713_v9, %v2762_v34 }
 0x12c   :  { %v327_v2 = vadd.f32 %v317_v54, %v276_v14  ;;  %v75_v17 = vmul.f32 %v2559_v16, %v2728_v15  ;;  %v76_v9 = vmul.f32 %v2563_v18, %v2728_v15  ;;  %v217_v16 = vsel %vm214_vm2, %v2773_v38, %v2822_v61 }
 0x12d   :  { %v128_v44 = vadd.f32 %v2760_v33, %v77_v58  ;;  %v218_v18 = vsel %vm214_vm2, %v2822_v61, %v2820_v60  ;;  %v269_v38 = vsel %vm265_vm3, %v2848_v13, %v2846_v12 }
 0x12f   :  { %753 = vrot.lane.b32.xlu1 %v738_v30, %s2475_s7  ;;  %749 = vrot.lane.b32.xlu2 %v736_v23, %s2475_s7  ;;  %v328_v30 = vadd.f32 %v318_v53, %v277_v45  ;;  %v179_v35 = vadd.f32 %v2790_v46, %v128_v44 }
 0x130   :  { %751 = vrot.lane.b32.xlu0 %v737_v36, %s2475_s7  ;;  %v116_v36 = vsel %vm112_vm0, %v2762_v34, %v2760_v33  ;;  %v167_v34 = vsel %vm163_vm1, %v2792_v48, %v2790_v46  ;;  %v126_v33 = vadd.f32 %v115_v29, %v75_v17  ;;  %v529_v17 = vmul.f32 %v2702_v5, %v2732_v21 }
 0x131   :  { %v2889_v31 = vpop.permute.xlu1 %314  ;;  %v2891_v26 = vpop.permute.xlu2 %386  ;;  %v127_v49 = vadd.f32 %v116_v36, %v76_v9  ;;  %v230_v46 = vadd.f32 %v2820_v60, %v179_v35 }
 0x132   :  { %v2894_v56 = vpop.permute.xlu0 %312 }
 0x133   :  { %v178_v20 = vadd.f32 %v167_v34, %v127_v49  ;;  %v319_v13 = vsel %vm316_vm4, %v2833_v1, %v2894_v56  ;;  %v281_v6 = vadd.f32 %v2846_v12, %v230_v46  ;;  %v534_v34 = vmul.f32 %v2717_v11, %v2728_v15 }
 0x135   :  { %v229_v52 = vadd.f32 %v218_v18, %v178_v20  ;;  %v332_v54 = vadd.f32 %v2889_v31, %v281_v6 }
 0x137   :  { %755 = vrot.lane.b32.xlu2 %v739_v43, %s2475_s7  ;;  %v320_v43 = vsel %vm316_vm4, %v2894_v56, %v2889_v31  ;;  %v280_v32 = vadd.f32 %v269_v38, %v229_v52 }
 0x138   :  { %757 = vrot.lane.b32.xlu0 %v740_v8, %s2475_s7  ;;  %s2109_s7 = sshll.u32 %s3859_s6, 4  ;;  %s2110_s7 = int_to_ptr.hbm [resolvable:$true] %s2109_s7 }
 0x139   :  { %v360_v3 = vpop.permute.xlu1 %359  ;;  %v2915_v51 = vpop.permute.xlu2 %549  ;;  %v331_v14 = vadd.f32 %v320_v43, %v280_v32 }
 0x13a   :  { %v380_v23 = vadd.f32 %v360_v3, %v329_v22  ;;  %v358_v63 = vpop.permute.xlu0 %357 }
 0x13b   :  { %v368_v19 = vsel %vm367_vm5, %v2844_v47, %v358_v63  ;;  %v369_v55 = vsel %vm367_vm5, %v358_v63, %v360_v3  ;;  %v166_v47 = vsel %vm163_vm1, %v2743_v25, %v2792_v48 }
 0x13c   :  { %v396_v37 = vadd.f32 %v2891_v26, %v380_v23  ;;  %v378_v27 = vadd.f32 %v368_v19, %v327_v2  ;;  %v379_v42 = vadd.f32 %v369_v55, %v328_v30  ;;  %v177_v57 = vadd.f32 %v166_v47, %v126_v33 }
 0x13d   :  { %v532_v19 = vmul.f32 %v2702_v5, %v2728_v15  ;;  %v533_v5 = vmul.f32 %v2715_v10, %v2728_v15 }
 0x13e   :  { %v402_v59 = vmax.f32 %v396_v37, 0.0  ;;  %v394_v4 = vadd.f32 %v2891_v26, %v378_v27  ;;  %v395_v28 = vadd.f32 %v2891_v26, %v379_v42  ;;  %v228_v40 = vadd.f32 %v217_v16, %v177_v57 }
 0x140   :  { %v2948_v25 = vpack.c.bf16 %v402_v59, %v402_v59  ;;  %v400_v50 = vmax.f32 %v394_v4, 0.0  ;;  %v401_v48 = vmax.f32 %v395_v28, 0.0  ;;  %v279_v7 = vadd.f32 %v268_v62, %v228_v40 }
 0x141   :  { %v366_v41 = vpop.permute.xlu1 %365  ;;  %v556_v39 = vpop.permute.xlu2 %555 }
 0x142   :  { %v2957_v0 = vpack.c.bf16 %v401_v48, %v400_v50  ;;  %v364_v61 = vpop.permute.xlu0 %363  ;;  %472 = vrot.lane.b32.xlu0 %v2948_v25, %s2472_s28  ;;  %497 = vrot.lane.b32.xlu2 %v2948_v25, %s2473_s29  ;;  %412 = vst.msk [vmem:[#allocation2 + $0x8] sm:$0xf] %vm411_vm6, %v2948_v25  ;;  %v330_v53 = vadd.f32 %v319_v13, %v279_v7 }
 0x143   :  { %v370_v8 = vsel %vm367_vm5, %v2859_v24, %v364_v61  ;;  %v371_v60 = vsel %vm367_vm5, %v364_v61, %v366_v41  ;;  %v383_v1 = vadd.f32 %v366_v41, %v332_v54  ;;  %v530_v48 = vmul.f32 %v2715_v10, %v2732_v21 }
 0x144   :  { %410 = vst [vmem:[#allocation2] sm:$0xff] %v2957_v0  ;;  %v381_v45 = vadd.f32 %v370_v8, %v330_v53  ;;  %v382_v22 = vadd.f32 %v371_v60, %v331_v14 }
 0x149   :  { %v548_v3 = vpop.permute.xlu1 %547  ;;  %v590_v56 = vpop.permute.xlu2 %589 }
 0x14a   :  { %v2978_v2 = vpop.permute.xlu0 %391  ;;  %v559_v44 = vsel %vm112_vm0, %v548_v3, %v2915_v51 }
 0x14b   :  { %v399_v12 = vadd.f32 %v2978_v2, %v383_v1  ;;  %v397_v30 = vadd.f32 %v2978_v2, %v381_v45  ;;  %v398_v23 = vadd.f32 %v2978_v2, %v382_v22  ;;  %v569_v9 = vadd.f32 %v559_v44, %v529_v17 }
 0x14d   :  { %v405_v24 = vmax.f32 %v399_v12, 0.0  ;;  %v403_v63 = vmax.f32 %v397_v30, 0.0  ;;  %v404_v58 = vmax.f32 %v398_v23, 0.0 }
 0x14f   :  { %v409_v29 = vpack.c.bf16 %v405_v24, %v405_v24  ;;  %v408_v31 = vpack.c.bf16 %v404_v58, %v403_v63  ;;  %v531_v58 = vmul.f32 %v2717_v11, %v2732_v21 }
 0x151   :  { %501 = vrot.lane.b32.xlu1 %v409_v29, %s2473_s29  ;;  %413 = vst [vmem:[#allocation2 + $0x14] sm:$0xff] %v408_v31  ;;  %499 = vrot.lane.b32.xlu0 %v408_v31, %s2473_s29  ;;  %v554_v55 = vpop.permute.xlu1 %553  ;;  %v596_v36 = vpop.permute.xlu2 %595 }
 0x152   :  { %476 = vrot.lane.b32.xlu2 %v409_v29, %s2472_s28  ;;  %v561_v37 = vsel %vm112_vm0, %v554_v55, %v556_v39  ;;  %v2989_v27 = vpop.permute.xlu0 %551  ;;  %414 = vst.msk [vmem:[#allocation2 + $0x1c] sm:$0xf] %vm411_vm6, %v409_v29 }
 0x153   :  { %v572_v42 = vadd.f32 %v561_v37, %v532_v19  ;;  %v560_v50 = vsel %vm112_vm0, %v2915_v51, %v2989_v27 }
 0x154   :  { %v570_v57 = vadd.f32 %v560_v50, %v530_v48 }
 0x159   :  { %445 = vrot.lane.b32.xlu0 %v2957_v0, %s2471_s27  ;;  %495 = vrot.lane.b32.xlu1 %v2957_v0, %s2473_s29  ;;  %v588_v47 = vpop.permute.xlu1 %587  ;;  %v630_v59 = vpop.permute.xlu2 %629 }
 0x15a   :  { %470 = vrot.lane.b32.xlu2 %v2957_v0, %s2472_s28  ;;  %v599_v4 = vsel %vm163_vm1, %v588_v47, %v590_v56  ;;  %v558_v28 = vpop.permute.xlu0 %557 }
 0x15b   :  { %v609_v33 = vadd.f32 %v599_v4, %v569_v9  ;;  %v562_v49 = vsel %vm112_vm0, %v556_v39, %v558_v28  ;;  %v3008_v16 = vadd.f32 %v558_v28, %v534_v34 }
 0x15c   :  { %v573_v18 = vadd.f32 %v562_v49, %v533_v5 }
 0x161   :  { %451 = vrot.lane.b32.xlu0 %v409_v29, %s2471_s27  ;;  %474 = vrot.lane.b32.xlu1 %v408_v31, %s2472_s28  ;;  %v594_v35 = vpop.permute.xlu1 %593  ;;  %v636_v15 = vpop.permute.xlu2 %635 }
 0x162   :  { %449 = vrot.lane.b32.xlu2 %v408_v31, %s2471_s27  ;;  %v601_v20 = vsel %vm163_vm1, %v594_v35, %v596_v36  ;;  %v592_v41 = vpop.permute.xlu0 %591 }
 0x163   :  { %v612_v39 = vadd.f32 %v601_v20, %v572_v42  ;;  %v600_v62 = vsel %vm163_vm1, %v590_v56, %v592_v41 }
 0x164   :  { %v610_v38 = vadd.f32 %v600_v62, %v570_v57 }
 0x169   :  { %423 = vrot.lane.b32.xlu0 %v408_v31, %s2470_s1  ;;  %447 = vrot.lane.b32.xlu1 %v2948_v25, %s2471_s27  ;;  %v628_v10 = vpop.permute.xlu1 %627  ;;  %v670_v51 = vpop.permute.xlu2 %669 }
 0x16a   :  { %421 = vrot.lane.b32.xlu2 %v2948_v25, %s2470_s1  ;;  %v639_v61 = vsel %vm214_vm2, %v628_v10, %v630_v59  ;;  %v598_v46 = vpop.permute.xlu0 %597 }
 0x16b   :  { %v649_v40 = vadd.f32 %v639_v61, %v609_v33  ;;  %v602_v52 = vsel %vm163_vm1, %v596_v36, %v598_v46 }
 0x16c   :  { %v613_v13 = vadd.f32 %v602_v52, %v573_v18  ;;  %v614_v18 = vadd.f32 %v598_v46, %v3008_v16 }
 0x171   :  { %419 = vrot.lane.b32.xlu1 %v2957_v0, %s2470_s1  ;;  %v634_v43 = vpop.permute.xlu1 %633  ;;  %v676_v6 = vpop.permute.xlu2 %675 }
 0x172   :  { %v641_v7 = vsel %vm214_vm2, %v634_v43, %v636_v15  ;;  %v632_v32 = vpop.permute.xlu0 %631 }
 0x173   :  { %v652_v8 = vadd.f32 %v641_v7, %v612_v39  ;;  %v640_v60 = vsel %vm214_vm2, %v630_v59, %v632_v32 }
 0x174   :  { %v650_v54 = vadd.f32 %v640_v60, %v610_v38 }
 0x179   :  { %425 = vrot.lane.b32.xlu1 %v409_v29, %s2470_s1  ;;  %v668_v25 = vpop.permute.xlu1 %667  ;;  %v710_v53 = vpop.permute.xlu2 %709  ;;  %v571_v29 = vadd.f32 %v2989_v27, %v531_v58 }
 0x17a   :  { %v638_v14 = vpop.permute.xlu0 %637  ;;  %v679_v31 = vsel %vm265_vm3, %v668_v25, %v670_v51 }
 0x17b   :  { %v642_v1 = vsel %vm214_vm2, %v636_v15, %v638_v14  ;;  %v611_v36 = vadd.f32 %v592_v41, %v571_v29  ;;  %v689_v42 = vadd.f32 %v679_v31, %v649_v40  ;;  %v654_v41 = vadd.f32 %v638_v14, %v614_v18 }
 0x17c   :  { %v653_v45 = vadd.f32 %v642_v1, %v613_v13 }
 0x17d   :  { %v651_v17 = vadd.f32 %v632_v32, %v611_v36 }
 0x181   :  { %v674_v22 = vpop.permute.xlu1 %673  ;;  %v716_v3 = vpop.permute.xlu2 %715 }
 0x182   :  { %v672_v0 = vpop.permute.xlu0 %671  ;;  %v681_v4 = vsel %vm265_vm3, %v674_v22, %v676_v6 }
 0x183   :  { %v680_v9 = vsel %vm265_vm3, %v670_v51, %v672_v0  ;;  %v691_v21 = vadd.f32 %v672_v0, %v651_v17  ;;  %v692_v15 = vadd.f32 %v681_v4, %v652_v8 }
 0x184   :  { %v690_v34 = vadd.f32 %v680_v9, %v650_v54 }
 0x189   :  { %v708_v56 = vpop.permute.xlu1 %707  ;;  %v750_v30 = vpop.permute.xlu2 %749 }
 0x18a   :  { %v678_v12 = vpop.permute.xlu0 %677  ;;  %v719_v37 = vsel %vm316_vm4, %v708_v56, %v710_v53 }
 0x18b   :  { %v729_v11 = vadd.f32 %v719_v37, %v689_v42  ;;  %v682_v39 = vsel %vm265_vm3, %v676_v6, %v678_v12  ;;  %v694_v16 = vadd.f32 %v678_v12, %v654_v41 }
 0x18c   :  { %v693_v40 = vadd.f32 %v682_v39, %v653_v45 }
 0x191   :  { %v714_v23 = vpop.permute.xlu1 %713  ;;  %v756_v63 = vpop.permute.xlu2 %755 }
 0x192   :  { %v712_v24 = vpop.permute.xlu0 %711  ;;  %v721_v50 = vsel %vm316_vm4, %v714_v23, %v716_v3 }
 0x193   :  { %v720_v27 = vsel %vm316_vm4, %v710_v53, %v712_v24  ;;  %v731_v5 = vadd.f32 %v712_v24, %v691_v21  ;;  %v732_v10 = vadd.f32 %v721_v50, %v692_v15 }
 0x194   :  { %v730_v28 = vadd.f32 %v720_v27, %v690_v34 }
 0x199   :  { %v748_v19 = vpop.permute.xlu1 %747 }
 0x19a   :  { %v718_v55 = vpop.permute.xlu0 %717  ;;  %v759_v47 = vsel %vm367_vm5, %v748_v19, %v750_v30 }
 0x19b   :  { %v769_v59 = vadd.f32 %v759_v47, %v729_v11  ;;  %v722_v61 = vsel %vm316_vm4, %v716_v3, %v718_v55  ;;  %v734_v7 = vadd.f32 %v718_v55, %v694_v16  ;;  %v30_v16 = vld [vmem:[%s3858_s5 + $0x28] sm:$0xff] }
 0x19c   :  { %v3038_v44 = vpop.permute.xlu2 %497  ;;  %v733_v6 = vadd.f32 %v722_v61, %v693_v40 }
 0x19d   :  { %517 = vst.msk [vmem:[#allocation2 + $0xa8] sm:$0xf] %vm411_vm6, %v3038_v44  ;;  %v775_v57 = vadd.f32 %v769_v59, %v2891_v26  ;;  %v504_v11 = vrot.slane %v3038_v44, 4  ;;  %v29_v59 = vld [vmem:[%s3858_s5 + $0x20] sm:$0xff] }
 0x19f   :  { %v781_v52 = vmax.f32 %v775_v57, 0.0 }
 0x1a1   :  { %v754_v33 = vpop.permute.xlu1 %753 }
 0x1a2   :  { %v752_v49 = vpop.permute.xlu0 %751  ;;  %v761_v62 = vsel %vm367_vm5, %v754_v33, %v756_v63 }
 0x1a3   :  { %v760_v48 = vsel %vm367_vm5, %v750_v30, %v752_v49  ;;  %v771_v35 = vadd.f32 %v752_v49, %v731_v5  ;;  %v772_v13 = vadd.f32 %v761_v62, %v732_v10  ;;  %v28_v10 = vld [vmem:[%s3858_s5 + $0x18] sm:$0xff] }
 0x1a4   :  { %v770_v20 = vadd.f32 %v760_v48, %v730_v28 }
 0x1a5   :  { %v777_v38 = vadd.f32 %v771_v35, %v2891_v26  ;;  %v778_v25 = vadd.f32 %v772_v13, %v2978_v2 }
 0x1a6   :  { %v776_v51 = vadd.f32 %v770_v20, %v2891_v26 }
 0x1a7   :  { %v783_v46 = vmax.f32 %v777_v38, 0.0  ;;  %v784_v3 = vmax.f32 %v778_v25, 0.0 }
 0x1a8   :  { %v782_v43 = vmax.f32 %v776_v51, 0.0  ;;  %v27_v51 = vld [vmem:[%s3858_s5 + $0x10] sm:$0xff] }
 0x1a9   :  { %v3055_v32 = vpack.c.bf16 %v783_v46, %v783_v46 }
 0x1aa   :  { %v3057_v8 = vpack.c.bf16 %v782_v43, %v781_v52  ;;  %v758_v60 = vpop.permute.xlu0 %757 }
 0x1ab   :  { %846 = vst.msk [vmem:[#allocation2 + $0x60] sm:$0xf] %vm818_vm7, %v3055_v32  ;;  %v762_v26 = vsel %vm367_vm5, %v756_v63, %v758_v60  ;;  %v774_v54 = vadd.f32 %v758_v60, %v734_v7  ;;  %875 = vrot.lane.b32.xlu0 %v3055_v32, %s2471_s27 }
 0x1ac   :  { %v773_v53 = vadd.f32 %v762_v26, %v733_v6  ;;  %v3065_v14 = vpop.permute.xlu2 %476  ;;  %873 = vrot.lane.b32.xlu2 %v3057_v8, %s2471_s27 }
 0x1ad   :  { %v780_v1 = vadd.f32 %v774_v54, %v2978_v2  ;;  %494 = vst.msk [vmem:[#allocation2 + $0x94] sm:$0xf] %vm411_vm6, %v3065_v14  ;;  %v481_v28 = vrot.slane %v3065_v14, 4 }
 0x1ae   :  { %v779_v45 = vadd.f32 %v773_v53, %v2978_v2 }
 0x1af   :  { %v786_v22 = vmax.f32 %v780_v1, 0.0 }
 0x1b0   :  { %v785_v0 = vmax.f32 %v779_v45, 0.0 }
 0x1b1   :  { %v790_v56 = vpack.c.bf16 %v786_v22, %v786_v22 }
 0x1b2   :  { %v789_v12 = vpack.c.bf16 %v785_v0, %v784_v3 }
 0x1b3   :  { %848 = vst.msk [vmem:[#allocation2 + $0x74] sm:$0xf] %vm818_vm7, %v790_v56  ;;  %849 = vrot.lane.b32.xlu0 %v3057_v8, %s2470_s1 }
 0x1b4   :  { %v471_v30 = vpop.permute.xlu2 %470  ;;  %879 = vrot.lane.b32.xlu2 %v790_v56, %s2471_s27  ;;  %877 = vrot.lane.b32.xlu1 %v789_v12, %s2471_s27  ;;  %v473_v23 = vpop.permute.xlu0 %472 }
 0x1b5   :  { %v478_v24 = vrot.slane %v471_v30, 4  ;;  %v479_v63 = vrot.slane %v473_v23, 4  ;;  %492 = vst.msk [vmem:[#allocation2 + $0x80] sm:$0xf] %vm411_vm6, %v473_v23 }
 0x1b7   :  { %v482_v2 = vsel %vm431_vm8, %v478_v24, %v479_v63 }
 0x1b8   :  { %v484_v58 = vsel %vm214_vm2, %v471_v30, %v482_v2 }
 0x1b9   :  { %491 = vst [vmem:[#allocation2 + $0x78] sm:$0xff] %v484_v58 }
 0x1bb   :  { %855 = vrot.lane.b32.xlu0 %v790_v56, %s2470_s1 }
 0x1bc   :  { %v450_v29 = vpop.permute.xlu2 %449  ;;  %853 = vrot.lane.b32.xlu2 %v789_v12, %s2470_s1  ;;  %851 = vrot.lane.b32.xlu1 %v3055_v32, %s2470_s1 }
 0x1bd   :  { %v455_v33 = vrot.slane %v450_v29, 4 }
 0x1c0   :  { %v2189_v43 = vld [vmem:[#allocation2 + $0x78] sm:$0xf]  ;;  %v2382_v7 = vld [vmem:[#allocation2 + $0x7c] sm:$0xf] }
 0x1c3   :  { %v502_v31 = vpop.permute.xlu1 %501  ;;  %v500_v19 = vpop.permute.xlu0 %499  ;;  %795 = vrot.lane.b32.xlu0 %v3057_v8, %s2476_s0 }
 0x1c4   :  { %v506_v55 = vrot.slane %v502_v31, 4  ;;  %519 = vst.msk [vmem:[#allocation2 + $0xbc] sm:$0xf] %vm411_vm6, %v502_v31  ;;  %v505_v36 = vrot.slane %v500_v19, 4  ;;  %v3088_v37 = vpop.permute.xlu2 %421  ;;  %826 = vrot.lane.b32.xlu2 %v789_v12, %s2477_s14  ;;  %822 = vrot.lane.b32.xlu1 %v3057_v8, %s2477_s14 }
 0x1c5   :  { %442 = vst.msk [vmem:[#allocation2 + $0x30] sm:$0xf] %vm411_vm6, %v3088_v37  ;;  %v428_v25 = vrot.slane %v3088_v37, 4  ;;  %v2369_v37 = vld [vmem:[#allocation2 + $0x10] sm:$0xf0] }
 0x1c6   :  { %v510_v42 = vsel %vm431_vm8, %v505_v36, %v506_v55 }
 0x1c7   :  { %v511_v17 = vsel %vm265_vm3, %v500_v19, %v510_v42  ;;  %v2131_v42 = vld [vmem:[#allocation2 + $0x14] sm:$0xf0] }
 0x1c8   :  { %518 = vst [vmem:[#allocation2 + $0xb4] sm:$0xff] %v511_v17  ;;  %v2129_v17 = vld [vmem:[#allocation2] sm:$0xf] }
 0x1cb   :  { %v446_v9 = vpop.permute.xlu0 %445  ;;  %v496_v47 = vpop.permute.xlu1 %495  ;;  %828 = vrot.lane.b32.xlu0 %v790_v56, %s2477_s14 }
 0x1cc   :  { %v503_v21 = vrot.slane %v496_v47, 4  ;;  %824 = vrot.lane.b32.xlu2 %v3055_v32, %s2477_s14  ;;  %799 = vrot.lane.b32.xlu1 %v789_v12, %s2476_s0  ;;  %v453_v46 = vrot.slane %v446_v9, 4 }
 0x1ce   :  { %v507_v27 = vsel %vm431_vm8, %v503_v21, %v504_v11  ;;  %v3142_v21 = vld [vmem:[%s3855_s2] sm:$0xff] }
 0x1cf   :  { %v509_v34 = vsel %vm265_vm3, %v496_v47, %v507_v27  ;;  %v2389_v35 = vld [vmem:[#allocation2 + $0xb0] sm:$0xf0]  ;;  %v2211_v39 = vld [vmem:[#allocation2 + $0xb4] sm:$0xf0]  ;;  %v2130_v47 = vor.u32 %v2369_v37, %v2129_v17 }
 0x1d0   :  { %516 = vst [vmem:[#allocation2 + $0xa0] sm:$0xff] %v509_v34  ;;  %v3151_v34 = vld [vmem:[%s3855_s2 + $0x8] sm:$0xff] }
 0x1d3   :  { %v452_v44 = vpop.permute.xlu0 %451  ;;  %v475_v5 = vpop.permute.xlu1 %474  ;;  %943 = vperm.xlu0 %2440, %v29_v59  }
 0x1d4   :  { %v456_v49 = vrot.slane %v452_v44, 4  ;;  %469 = vst.msk [vmem:[#allocation2 + $0x6c] sm:$0xf] %vm411_vm6, %v452_v44  ;;  %v480_v18 = vrot.slane %v475_v5, 4  ;;  %801 = vrot.lane.b32.xlu2 %v790_v56, %s2476_s0  ;;  %797 = vrot.lane.b32.xlu1 %v3055_v32, %s2476_s0 }
 0x1d5   :  { %847 = vst.msk [vmem:[#allocation2 + $0x6c] sm:$0xff] %vm3103_vm11, %v789_v12 }
 0x1d6   :  { %v460_v50 = vsel %vm431_vm8, %v455_v33, %v456_v49  ;;  %v485_v48 = vsel %vm431_vm8, %v480_v18, %v481_v28 }
 0x1d7   :  { %v461_v15 = vsel %vm163_vm1, %v450_v29, %v460_v50  ;;  %v486_v57 = vsel %vm214_vm2, %v475_v5, %v485_v48  ;;  %v2209_v20 = vld [vmem:[#allocation2 + $0xa0] sm:$0xf]  ;;  %v2387_v41 = vld [vmem:[#allocation2 + $0xa4] sm:$0xf] }
 0x1d8   :  { %468 = vst [vmem:[#allocation2 + $0x64] sm:$0xff] %v461_v15  ;;  %v2210_v62 = vor.u32 %v2389_v35, %v2209_v20  ;;  %v2214_v38 = vor.u32 %v2387_v41, %v2211_v39 }
 0x1d9   :  { %493 = vst [vmem:[#allocation2 + $0x8c] sm:$0xff] %v486_v57 }
 0x1da   :  { %1101 = vmatpush.bf16.msra.mxu0 %v2210_v62  ;;  %1120 = vmatpush.bf16.msra.mxu1 %v2214_v38 }
 0x1db   :  { %v448_v61 = vpop.permute.xlu1 %447  ;;  %938 = vperm.xlu0 %2440, %v28_v10   ;;  %v424_v12 = vpop.permute.xlu0 %423 }
 0x1dc   :  { %v454_v40 = vrot.slane %v448_v61, 4  ;;  %467 = vst.msk [vmem:[#allocation2 + $0x58] sm:$0xf] %vm411_vm6, %v448_v61  ;;  %933 = vperm.xlu2 %2442, %v27_v51   ;;  %948 = vperm.xlu1 %2441, %v30_v16   ;;  %v429_v23 = vrot.slane %v424_v12, 4 }
 0x1dd   :  { %845 = vst.msk [vmem:[#allocation2 + $0x58] sm:$0xff] %vm3103_vm11, %v3057_v8 }
 0x1de   :  { %v457_v52 = vsel %vm431_vm8, %v453_v46, %v454_v40 }
 0x1df   :  { %v459_v13 = vsel %vm163_vm1, %v446_v9, %v457_v52  ;;  %v2379_v8 = vld [vmem:[#allocation2 + $0x60] sm:$0xf0]  ;;  %v2171_v3 = vld [vmem:[#allocation2 + $0x64] sm:$0xf0] }
 0x1e0   :  { %466 = vst [vmem:[#allocation2 + $0x50] sm:$0xff] %v459_v13  ;;  %v2384_v32 = vld [vmem:[#allocation2 + $0x88] sm:$0xf0]  ;;  %v2191_v6 = vld [vmem:[#allocation2 + $0x8c] sm:$0xf0] }
 0x1e1   :  { %v2190_v60 = vor.u32 %v2384_v32, %v2189_v43  ;;  %v2194_v26 = vor.u32 %v2382_v7, %v2191_v6  ;;  %v2367_v9 = vld [vmem:[#allocation2 + $0x4] sm:$0xf] }
 0x1e2   :  { %v2134_v11 = vor.u32 %v2367_v9, %v2131_v42 }
 0x1e3   :  { %1102 = vmatpush.bf16.msra.mxu0 %v2190_v60  ;;  %1121 = vmatpush.bf16.msra.mxu1 %v2194_v26  ;;  %v420_v54 = vpop.permute.xlu1 %419 }
 0x1e4   :  { %v427_v53 = vrot.slane %v420_v54, 4  ;;  %v2177_v42 = vld [vmem:[#allocation2 + $0x58] sm:$0xf]  ;;  %v2378_v17 = vld [vmem:[#allocation2 + $0x5c] sm:$0xf] }
 0x1e6   :  { %v432_v14 = vsel %vm431_vm8, %v427_v53, %v428_v25 }
 0x1e7   :  { %v434_v1 = vsel %vm112_vm0, %v420_v54, %v432_v14  ;;  %v2169_v45 = vld [vmem:[#allocation2 + $0x50] sm:$0xf]  ;;  %v2377_v22 = vld [vmem:[#allocation2 + $0x54] sm:$0xf] }
 0x1e8   :  { %441 = vst [vmem:[#allocation2 + $0x28] sm:$0xff] %v434_v1  ;;  %v2170_v0 = vor.u32 %v2379_v8, %v2169_v45  ;;  %v2174_v56 = vor.u32 %v2377_v22, %v2171_v3 }
 0x1ea   :  { %1103 = vmatpush.bf16.msra.mxu0 %v2170_v0  ;;  %1122 = vmatpush.bf16.msra.mxu1 %v2174_v56 }
 0x1eb   :  { %v426_v30 = vpop.permute.xlu1 %425 }
 0x1ec   :  { %v430_v24 = vrot.slane %v426_v30, 4  ;;  %444 = vst.msk [vmem:[#allocation2 + $0x44] sm:$0xf] %vm411_vm6, %v426_v30 }
 0x1ee   :  { %v435_v63 = vsel %vm431_vm8, %v429_v23, %v430_v24  ;;  %v2381_v23 = vld [vmem:[#allocation2 + $0x70] sm:$0xf0] }
 0x1ef   :  { %v436_v2 = vsel %vm112_vm0, %v424_v12, %v435_v63  ;;  %v2149_v58 = vld [vmem:[#allocation2 + $0x28] sm:$0xf]  ;;  %v2372_v31 = vld [vmem:[#allocation2 + $0x2c] sm:$0xf] }
 0x1f0   :  { %443 = vst [vmem:[#allocation2 + $0x3c] sm:$0xff] %v436_v2 }
 0x1f7   :  { %v2374_v29 = vld [vmem:[#allocation2 + $0x38] sm:$0xf0]  ;;  %v2151_v19 = vld [vmem:[#allocation2 + $0x3c] sm:$0xf0] }
 0x1f8   :  { %v2150_v55 = vor.u32 %v2374_v29, %v2149_v58  ;;  %v2154_v36 = vor.u32 %v2372_v31, %v2151_v19 }
 0x1fa   :  { %1104 = vmatpush.bf16.msra.mxu0 %v2150_v55  ;;  %1123 = vmatpush.bf16.msra.mxu1 %v2154_v36  ;;  %v2185_v36 = vld [vmem:[#allocation2 + $0x60] sm:$0xf] }
 0x1fb   :  { %v2186_v37 = vor.u32 %v2381_v23, %v2185_v36 }
 0x1fe   :  { %1105 = vmatpush.bf16.msra.mxu0 %v2130_v47  ;;  %1124 = vmatpush.bf16.msra.mxu1 %v2134_v11 }
 0x201   :  { %2227 = vmatmul.msk.bf16.vlgmr.msra.gmra.mxu0 %vm1091_vm12, %v3142_v21  ;;  %2229 = vmatmul.msk.bf16.vlgmr.msra.gmra.mxu1 %vm1091_vm12, %v3142_v21 }
 0x206   :  { %v874_v27 = vpop.permute.xlu2 %873 }
 0x207   :  { %v881_v28 = vrot.slane %v874_v27, 4 }
 0x20e   :  { %v880_v59 = vpop.permute.xlu2 %879 }
 0x20f   :  { %896 = vst.msk [vmem:[#allocation2 + $0xc4] sm:$0xf] %vm818_vm7, %v880_v59  ;;  %v884_v62 = vrot.slane %v880_v59, 4  ;;  %v2179_v59 = vld [vmem:[#allocation2 + $0x6c] sm:$0xf0] }
 0x211   :  { %2228 = vmatmul.msk.bf16.gmra.mxu0 %vm1091_vm12, %v3151_v34  ;;  %2230 = vmatmul.msk.bf16.gmra.mxu1 %vm1091_vm12, %v3151_v34 }
 0x216   :  { %v854_v44 = vpop.permute.xlu2 %853  ;;  %v2391_v20 = vld [vmem:[#allocation2 + $0xc0] sm:$0xf0] }
 0x217   :  { %v859_v61 = vrot.slane %v854_v44, 4 }
 0x21d   :  { %v876_v5 = vpop.permute.xlu0 %875 }
 0x21e   :  { %v882_v33 = vrot.slane %v876_v5, 4  ;;  %894 = vst.msk [vmem:[#allocation2 + $0xb0] sm:$0xf] %vm818_vm7, %v876_v5  ;;  %v3159_v49 = vpop.permute.xlu2 %826 }
 0x21f   :  { %v831_v18 = vrot.slane %v3159_v49, 4 }
 0x220   :  { %v885_v50 = vsel %vm431_vm8, %v881_v28, %v882_v33  ;;  %v2182_v28 = vor.u32 %v2378_v17, %v2179_v59 }
 0x221   :  { %v886_v48 = vsel %vm163_vm1, %v874_v27, %v885_v50  ;;  %v835_v35 = vsel %vm832_vm13, %v831_v18, %v3159_v49  ;;  %v2380_v27 = vld [vmem:[#allocation2 + $0x68] sm:$0xf0] }
 0x222   :  { %893 = vst.msk [vmem:[#allocation2 + $0xa8] sm:$0xff] %vm3103_vm11, %v886_v48  ;;  %v2178_v5 = vor.u32 %v2380_v27, %v2177_v42 }
 0x223   :  { %843 = vst.msk [vmem:[#allocation2 + $0x44] sm:$0xff] %vm3103_vm11, %v835_v35 }
 0x225   :  { %v850_v15 = vpop.permute.xlu0 %849  ;;  %v2225_v57 = vld [vmem:[#allocation2 + $0xb0] sm:$0xf] }
 0x226   :  { %v878_v41 = vpop.permute.xlu1 %877  ;;  %v2226_v39 = vor.u32 %v2391_v20, %v2225_v57  ;;  %v857_v52 = vrot.slane %v850_v15, 4  ;;  %v825_v45 = vpop.permute.xlu2 %824 }
 0x227   :  { %v883_v38 = vrot.slane %v878_v41, 4 }
 0x228   :  { %1177 = vmatpush.bf16.msrb.mxu0 %v2226_v39 }
 0x229   :  { %v887_v10 = vsel %vm431_vm8, %v883_v38, %v884_v62  ;;  %v2217_v6 = vld [vmem:[#allocation2 + $0xa8] sm:$0xf]  ;;  %v2388_v60 = vld [vmem:[#allocation2 + $0xac] sm:$0xf] }
 0x22a   :  { %v888_v51 = vsel %vm163_vm1, %v878_v41, %v887_v10  ;;  %v2375_v50 = vld [vmem:[#allocation2 + $0x40] sm:$0xf0] }
 0x22b   :  { %895 = vst.msk [vmem:[#allocation2 + $0xbc] sm:$0xff] %vm3103_vm11, %v888_v51 }
 0x22d   :  { %v856_v16 = vpop.permute.xlu0 %855 }
 0x22e   :  { %v860_v46 = vrot.slane %v856_v16, 4  ;;  %872 = vst.msk [vmem:[#allocation2 + $0x9c] sm:$0xf] %vm818_vm7, %v856_v16  ;;  %v852_v40 = vpop.permute.xlu1 %851  ;;  %v802_v33 = vpop.permute.xlu2 %801 }
 0x22f   :  { %v858_v13 = vrot.slane %v852_v40, 4  ;;  %870 = vst.msk [vmem:[#allocation2 + $0x88] sm:$0xf] %vm818_vm7, %v852_v40 }
 0x230   :  { %v863_v43 = vsel %vm431_vm8, %v859_v61, %v860_v46 }
 0x231   :  { %v864_v7 = vsel %vm112_vm0, %v854_v44, %v863_v43  ;;  %v861_v32 = vsel %vm431_vm8, %v857_v52, %v858_v13 }
 0x232   :  { %871 = vst.msk [vmem:[#allocation2 + $0x94] sm:$0xff] %vm3103_vm11, %v864_v7  ;;  %v862_v26 = vsel %vm112_vm0, %v850_v15, %v861_v32  ;;  %v2390_v54 = vld [vmem:[#allocation2 + $0xb8] sm:$0xf0]  ;;  %v2219_v25 = vld [vmem:[#allocation2 + $0xbc] sm:$0xf0] }
 0x233   :  { %869 = vst.msk [vmem:[#allocation2 + $0x80] sm:$0xff] %vm3103_vm11, %v862_v26  ;;  %v2218_v53 = vor.u32 %v2390_v54, %v2217_v6  ;;  %v2222_v14 = vor.u32 %v2388_v60, %v2219_v25 }
 0x235   :  { %v796_v8 = vpop.permute.xlu0 %795  ;;  %1139 = vmatpush.bf16.msra.mxu2 %v2218_v53  ;;  %1158 = vmatpush.bf16.msra.mxu3 %v2222_v14  ;;  %v2386_v1 = vld [vmem:[#allocation2 + $0x98] sm:$0xf0] }
 0x236   :  { %v803_v22 = vrot.slane %v796_v8, 4  ;;  %v823_v3 = vpop.permute.xlu1 %822  ;;  %v2205_v0 = vld [vmem:[#allocation2 + $0x88] sm:$0xf]  ;;  %v3219_v32 = vpop.permute.xlu2 %933 }
 0x237   :  { %v830_v56 = vrot.slane %v823_v3, 4  ;;  %v2206_v12 = vor.u32 %v2386_v1, %v2205_v0 }
 0x238   :  { %v806_v30 = vsel %vm805_vm14, %v803_v22, %v796_v8 }
 0x239   :  { %817 = vst.msk [vmem:[#allocation2 + $0x8] sm:$0xff] %vm3103_vm11, %v806_v30  ;;  %v833_v24 = vsel %vm832_vm13, %v830_v56, %v823_v3  ;;  %v834_v63 = vsel %vm832_vm13, %v830_v56, %v825_v45  ;;  %1178 = vmatpush.bf16.msrb.mxu0 %v2206_v12  ;;  %v2385_v2 = vld [vmem:[#allocation2 + $0x90] sm:$0xf0]  ;;  %v2199_v58 = vld [vmem:[#allocation2 + $0x94] sm:$0xf0] }
 0x23a   :  { %841 = vst.msk [vmem:[#allocation2 + $0x30] sm:$0xff] %vm3103_vm11, %v833_v24  ;;  %v2197_v29 = vld [vmem:[#allocation2 + $0x80] sm:$0xf]  ;;  %v2383_v31 = vld [vmem:[#allocation2 + $0x84] sm:$0xf] }
 0x23b   :  { %842 = vst.msk [vmem:[#allocation2 + $0x38] sm:$0xf] %vm818_vm7, %v834_v63  ;;  %v2198_v19 = vor.u32 %v2385_v2, %v2197_v29  ;;  %v2202_v55 = vor.u32 %v2383_v31, %v2199_v58 }
 0x23d   :  { %v829_v9 = vpop.permute.xlu0 %828  ;;  %1140 = vmatpush.bf16.msra.mxu2 %v2198_v19  ;;  %1159 = vmatpush.bf16.msra.mxu3 %v2202_v55 }
 0x23e   :  { %v836_v47 = vsel %vm832_vm13, %v831_v18, %v829_v9  ;;  %1179 = vmatpush.bf16.msrb.mxu0 %v2186_v37  ;;  %v800_v11 = vpop.permute.xlu1 %799  ;;  %v2159_v18 = vld [vmem:[#allocation2 + $0x44] sm:$0xf0] }
 0x23f   :  { %844 = vst.msk [vmem:[#allocation2 + $0x4c] sm:$0xf] %vm818_vm7, %v836_v47  ;;  %v804_v44 = vrot.slane %v800_v11, 4 }
 0x240   :  { %v2137_v51 = vld [vmem:[#allocation2 + $0x8] sm:$0xf]  ;;  %v2368_v61 = vld [vmem:[#allocation2 + $0xc] sm:$0xf] }
 0x241   :  { %v808_v48 = vsel %vm805_vm14, %v804_v44, %v800_v11  ;;  %v809_v35 = vsel %vm805_vm14, %v804_v44, %v802_v33  ;;  %1141 = vmatpush.bf16.msra.mxu2 %v2178_v5  ;;  %1160 = vmatpush.bf16.msra.mxu3 %v2182_v28  ;;  %v2157_v49 = vld [vmem:[#allocation2 + $0x30] sm:$0xf]  ;;  %v2373_v15 = vld [vmem:[#allocation2 + $0x34] sm:$0xf] }
 0x242   :  { %820 = vst.msk [vmem:[#allocation2 + $0x1c] sm:$0xff] %vm3103_vm11, %v808_v48  ;;  %v2158_v57 = vor.u32 %v2375_v50, %v2157_v49  ;;  %v2162_v20 = vor.u32 %v2373_v15, %v2159_v18  ;;  %v2165_v39 = vld [vmem:[#allocation2 + $0x38] sm:$0xf] }
 0x243   :  { %821 = vst.msk [vmem:[#allocation2 + $0x24] sm:$0xf] %vm818_vm7, %v809_v35 }
 0x245   :  { %1142 = vmatpush.bf16.msra.mxu2 %v2158_v57  ;;  %1161 = vmatpush.bf16.msra.mxu3 %v2162_v20  ;;  %v3217_v7 = vpop.permute.xlu0 %943 }
 0x246   :  { %v798_v41 = vpop.permute.xlu1 %797  ;;  %v2376_v62 = vld [vmem:[#allocation2 + $0x48] sm:$0xf0] }
 0x247   :  { %v807_v38 = vsel %vm805_vm14, %v803_v22, %v798_v41  ;;  %v2166_v10 = vor.u32 %v2376_v62, %v2165_v39 }
 0x248   :  { %819 = vst.msk [vmem:[#allocation2 + $0x10] sm:$0xf] %vm818_vm7, %v807_v38 }
 0x249   :  { %1180 = vmatpush.bf16.msrb.mxu0 %v2166_v10  ;;  %v2370_v16 = vld [vmem:[#allocation2 + $0x18] sm:$0xf0]  ;;  %v2139_v4 = vld [vmem:[#allocation2 + $0x1c] sm:$0xf0] }
 0x24a   :  { %v2138_v46 = vor.u32 %v2370_v16, %v2137_v51  ;;  %v2142_v40 = vor.u32 %v2368_v61, %v2139_v4  ;;  %v2371_v13 = vld [vmem:[#allocation2 + $0x20] sm:$0xf0] }
 0x24c   :  { %1143 = vmatpush.bf16.msra.mxu2 %v2138_v46  ;;  %1162 = vmatpush.bf16.msra.mxu3 %v2142_v40 }
 0x24d   :  { %v3223_v14 = vpop.permute.xlu0 %938 }
 0x24e   :  { %v3232_v58 = vpop.permute.xlu1 %948 }
 0x24f   :  { %2231 = vmatmul.msk.bf16.vlgmr.msra.gmra.mxu2 %vm1091_vm12, %v3142_v21  ;;  %2233 = vmatmul.msk.bf16.vlgmr.msra.gmra.mxu3 %vm1091_vm12, %v3142_v21  ;;  %v2145_v52 = vld [vmem:[#allocation2 + $0x10] sm:$0xf] }
 0x250   :  { %v2146_v43 = vor.u32 %v2371_v13, %v2145_v52 }
 0x252   :  { %1181 = vmatpush.bf16.msrb.mxu0 %v2146_v43 }
 0x255   :  { %2235 = vmatmul.msk.bf16.vlgmr.msrb.gmra.mxu0 %vm1091_vm12, %v3142_v21 }
 0x25f   :  { %2232 = vmatmul.msk.bf16.gmra.mxu2 %vm1091_vm12, %v3151_v34  ;;  %2234 = vmatmul.msk.bf16.gmra.mxu3 %vm1091_vm12, %v3151_v34 }
 0x265   :  { %2236 = vmatmul.msk.bf16.gmra.mxu0 %vm1091_vm12, %v3151_v34 }
 0x27e   :  { %v1107_v6 = vpop.f32.mrf.mxu0  ;;  %v1126_v60 = vpop.f32.mrf.mxu1 }
 0x27f   :  { %v1108_v26 = vadd.f32 %v1107_v6, %v3219_v32  ;;  %v1127_v54 = vadd.f32 %v1126_v60, %v3219_v32 }
 0x281   :  { %v1193_v21 = vmax.f32 %v1108_v26, 0.0  ;;  %v1194_v25 = vmax.f32 %v1127_v54, 0.0 }
 0x283   :  { %v1213_v53 = vpack.c.bf16 %v1194_v25, %v1193_v21 }
 0x285   :  { %1225 = vst [vmem:[#allocation3] sm:$0xff] %v1213_v53  ;;  %1277 = vrot.lane.b32.xlu2 %v1213_v53, %s2471_s27 }
 0x286   :  { %v1109_v8 = vpop.f32.mrf.mxu0  ;;  %v1128_v34 = vpop.f32.mrf.mxu1 }
 0x287   :  { %v1110_v1 = vadd.f32 %v1109_v8, %v3223_v14  ;;  %v1129_v45 = vadd.f32 %v1128_v34, %v3223_v14 }
 0x289   :  { %v1198_v22 = vmax.f32 %v1110_v1, 0.0  ;;  %v1199_v3 = vmax.f32 %v1129_v45, 0.0 }
 0x28b   :  { %v1216_v0 = vpack.c.bf16 %v1199_v3, %v1198_v22  ;;  %v31_v3 = vld [vmem:[%s3858_s5 + $0x30] sm:$0xff] }
 0x28d   :  { %1226 = vst [vmem:[#allocation3 + $0x10] sm:$0xff] %v1216_v0  ;;  %1281 = vrot.lane.b32.xlu1 %v1216_v0, %s2471_s27  ;;  %1237 = vrot.lane.b32.xlu2 %v1213_v53, %s2470_s1 }
 0x28e   :  { %v1112_v56 = vpop.f32.mrf.mxu0  ;;  %v1131_v12 = vpop.f32.mrf.mxu1 }
 0x28f   :  { %v1113_v30 = vadd.f32 %v1112_v56, %v3217_v7  ;;  %v1132_v23 = vadd.f32 %v1131_v12, %v3217_v7  ;;  %v34_v12 = vld [vmem:[%s3858_s5 + $0x48] sm:$0xff] }
 0x291   :  { %v1203_v24 = vmax.f32 %v1113_v30, 0.0  ;;  %v1204_v63 = vmax.f32 %v1132_v23, 0.0  ;;  %v33_v30 = vld [vmem:[%s3858_s5 + $0x40] sm:$0xff]  ;;  %v38_v23 = vld [vmem:[%s3858_s5 + $0x68] sm:$0xff] }
 0x293   :  { %v1219_v2 = vpack.c.bf16 %v1204_v63, %v1203_v24 }
 0x295   :  { %1227 = vst [vmem:[#allocation3 + $0x20] sm:$0xff] %v1219_v2  ;;  %1241 = vrot.lane.b32.xlu1 %v1216_v0, %s2470_s1  ;;  %v35_v0 = vld [vmem:[%s3858_s5 + $0x50] sm:$0xff] }
 0x296   :  { %v1114_v29 = vpop.f32.mrf.mxu0  ;;  %v1133_v31 = vpop.f32.mrf.mxu1 }
 0x297   :  { %v1115_v19 = vadd.f32 %v1114_v29, %v3232_v58  ;;  %v1134_v55 = vadd.f32 %v1133_v31, %v3232_v58  ;;  %v37_v29 = vld [vmem:[%s3858_s5 + $0x60] sm:$0xff]  ;;  %v36_v31 = vld [vmem:[%s3858_s5 + $0x58] sm:$0xff] }
 0x299   :  { %v1208_v36 = vmax.f32 %v1115_v19, 0.0  ;;  %v1209_v37 = vmax.f32 %v1134_v55, 0.0 }
 0x29b   :  { %v1222_v42 = vpack.c.bf16 %v1209_v37, %v1208_v36 }
 0x29d   :  { %1228 = vst [vmem:[#allocation3 + $0x30] sm:$0xff] %v1222_v42 }
 0x2d2   :  { %v1145_v17 = vpop.f32.mrf.mxu2  ;;  %v1164_v9 = vpop.f32.mrf.mxu3 }
 0x2d3   :  { %v1146_v47 = vadd.f32 %v1145_v17, %v3219_v32  ;;  %v1165_v11 = vadd.f32 %v1164_v9, %v3219_v32  ;;  %v1183_v41 = vpop.f32.mrf.mxu0 }
 0x2d4   :  { %v1184_v60 = vadd.f32 %v1183_v41, %v3219_v32 }
 0x2d5   :  { %v1195_v27 = vmax.f32 %v1146_v47, 0.0  ;;  %v1196_v59 = vmax.f32 %v1165_v11, 0.0 }
 0x2d6   :  { %v1197_v54 = vmax.f32 %v1184_v60, 0.0 }
 0x2d7   :  { %v1214_v44 = vpack.c.bf16 %v1196_v59, %v1195_v27 }
 0x2d8   :  { %v1215_v25 = vpack.c.bf16 %v1197_v54, %v1197_v54 }
 0x2d9   :  { %1279 = vrot.lane.b32.xlu0 %v1214_v44, %s2471_s27  ;;  %1349 = vrot.lane.b32.xlu2 %v1214_v44, %s2472_s28 }
 0x2da   :  { %v1147_v5 = vpop.f32.mrf.mxu2  ;;  %v1166_v28 = vpop.f32.mrf.mxu3 }
 0x2db   :  { %v1148_v33 = vadd.f32 %v1147_v5, %v3223_v14  ;;  %v1167_v50 = vadd.f32 %v1166_v28, %v3223_v14  ;;  %v1185_v10 = vpop.f32.mrf.mxu0 }
 0x2dc   :  { %v1186_v53 = vadd.f32 %v1185_v10, %v3223_v14  ;;  %v32_v14 = vld [vmem:[%s3858_s5 + $0x38] sm:$0xff] }
 0x2dd   :  { %v1200_v48 = vmax.f32 %v1148_v33, 0.0  ;;  %v1201_v35 = vmax.f32 %v1167_v50, 0.0 }
 0x2de   :  { %v1202_v8 = vmax.f32 %v1186_v53, 0.0 }
 0x2df   :  { %v1217_v49 = vpack.c.bf16 %v1201_v35, %v1200_v48  ;;  %v1278_v45 = vpop.permute.xlu2 %1277 }
 0x2e0   :  { %v1218_v1 = vpack.c.bf16 %v1202_v8, %v1202_v8  ;;  %v1293_v27 = vrot.slane %v1278_v45, 4 }
 0x2e1   :  { %1353 = vrot.lane.b32.xlu1 %v1217_v49, %s2472_s28  ;;  %1239 = vrot.lane.b32.xlu0 %v1214_v44, %s2470_s1 }
 0x2e2   :  { %1283 = vrot.lane.b32.xlu2 %v1217_v49, %s2471_s27  ;;  %v1150_v15 = vpop.f32.mrf.mxu2  ;;  %v1169_v18 = vpop.f32.mrf.mxu3 }
 0x2e3   :  { %v1151_v57 = vadd.f32 %v1150_v15, %v3217_v7  ;;  %v1170_v20 = vadd.f32 %v1169_v18, %v3217_v7  ;;  %v1188_v52 = vpop.f32.mrf.mxu0 }
 0x2e4   :  { %v1189_v43 = vadd.f32 %v1188_v52, %v3217_v7 }
 0x2e5   :  { %v1205_v39 = vmax.f32 %v1151_v57, 0.0  ;;  %v1206_v62 = vmax.f32 %v1170_v20, 0.0 }
 0x2e6   :  { %v1207_v6 = vmax.f32 %v1189_v43, 0.0 }
 0x2e7   :  { %v1220_v38 = vpack.c.bf16 %v1206_v62, %v1205_v39  ;;  %v1238_v22 = vpop.permute.xlu2 %1237 }
 0x2e8   :  { %v1221_v26 = vpack.c.bf16 %v1207_v6, %v1207_v6  ;;  %v1253_v48 = vrot.slane %v1238_v22, 4 }
 0x2e9   :  { %1285 = vrot.lane.b32.xlu1 %v1219_v2, %s2471_s27  ;;  %1389 = vrot.lane.b32.xlu0 %v1214_v44, %s2473_s29 }
 0x2ea   :  { %1243 = vrot.lane.b32.xlu2 %v1217_v49, %s2470_s1  ;;  %v1152_v51 = vpop.f32.mrf.mxu2  ;;  %v1171_v16 = vpop.f32.mrf.mxu3 }
 0x2eb   :  { %v1153_v61 = vadd.f32 %v1152_v51, %v3232_v58  ;;  %v1172_v4 = vadd.f32 %v1171_v16, %v3232_v58  ;;  %v1190_v21 = vpop.f32.mrf.mxu0 }
 0x2ec   :  { %v1191_v7 = vadd.f32 %v1190_v21, %v3232_v58 }
 0x2ed   :  { %v1210_v46 = vmax.f32 %v1153_v61, 0.0  ;;  %v1211_v40 = vmax.f32 %v1172_v4, 0.0 }
 0x2ee   :  { %v1212_v32 = vmax.f32 %v1191_v7, 0.0 }
 0x2ef   :  { %v1223_v13 = vpack.c.bf16 %v1211_v40, %v1210_v46 }
 0x2f0   :  { %v1224_v34 = vpack.c.bf16 %v1212_v32, %v1212_v32 }
 0x2f1   :  { %1247 = vrot.lane.b32.xlu1 %v1220_v38, %s2470_s1  ;;  %1245 = vrot.lane.b32.xlu0 %v1219_v2, %s2470_s1 }
 0x2f2   :  { %1393 = vrot.lane.b32.xlu2 %v1217_v49, %s2473_s29 }
 0x2f9   :  { %1397 = vrot.lane.b32.xlu1 %v1220_v38, %s2473_s29  ;;  %1289 = vrot.lane.b32.xlu0 %v1222_v42, %s2471_s27 }
 0x2fa   :  { %1287 = vrot.lane.b32.xlu2 %v1220_v38, %s2471_s27 }
 0x2ff   :  { %v1282_v24 = vpop.permute.xlu1 %1281 }
 0x300   :  { %v1295_v2 = vrot.slane %v1282_v24, 4 }
 0x301   :  { %1357 = vrot.lane.b32.xlu1 %v1220_v38, %s2472_s28  ;;  %1251 = vrot.lane.b32.xlu0 %v1223_v13, %s2470_s1 }
 0x302   :  { %1249 = vrot.lane.b32.xlu2 %v1222_v42, %s2470_s1 }
 0x307   :  { %v1242_v36 = vpop.permute.xlu1 %1241 }
 0x308   :  { %v1255_v42 = vrot.slane %v1242_v36, 4 }
 0x309   :  { %1291 = vrot.lane.b32.xlu1 %v1223_v13, %s2471_s27  ;;  %1401 = vrot.lane.b32.xlu0 %v1223_v13, %s2473_s29 }
 0x30a   :  { %1399 = vrot.lane.b32.xlu2 %v1221_v26, %s2473_s29 }
 0x311   :  { %1391 = vrot.lane.b32.xlu1 %v1215_v25, %s2473_s29  ;;  %1361 = vrot.lane.b32.xlu0 %v1223_v13, %s2472_s28 }
 0x312   :  { %1359 = vrot.lane.b32.xlu2 %v1221_v26, %s2472_s28 }
 0x319   :  { %1403 = vrot.lane.b32.xlu1 %v1224_v34, %s2473_s29  ;;  %1351 = vrot.lane.b32.xlu0 %v1215_v25, %s2472_s28 }
 0x31a   :  { %1355 = vrot.lane.b32.xlu2 %v1218_v1, %s2472_s28 }
 0x321   :  { %1363 = vrot.lane.b32.xlu1 %v1224_v34, %s2472_s28  ;;  %1395 = vrot.lane.b32.xlu0 %v1218_v1, %s2473_s29  ;;  %s2107_s28 = sshll.u32 %s2478_s9, 4  ;;  %s2108_s28 = int_to_ptr.vmem [resolvable:$true] %s2107_s28 }
 0x322   :  { %1321 = vrot.lane.b32.xlu2 %v1215_v25, %s2471_s27 }
 0x329   :  { %1327 = vrot.lane.b32.xlu1 %v1224_v34, %s2471_s27  ;;  %1325 = vrot.lane.b32.xlu0 %v1221_v26, %s2471_s27 }
 0x32a   :  { %1468 = vperm.xlu2 %2442, %v32_v14  }
 0x331   :  { %1463 = vperm.xlu1 %2441, %v31_v3   ;;  %1323 = vrot.lane.b32.xlu0 %v1218_v1, %s2471_s27 }
 0x332   :  { %1483 = vperm.xlu2 %2442, %v35_v0  }
 0x333   :  { %v3290_v56 = vpop.permute.xlu2 %1349 }
 0x339   :  { %1478 = vperm.xlu1 %2441, %v34_v12   ;;  %1473 = vperm.xlu0 %2440, %v33_v30  }
 0x33a   :  { %1498 = vperm.xlu2 %2442, %v38_v23  }
 0x33c   :  { %v3301_v63 = vpop.permute.xlu2 %1283 }
 0x33d   :  { %v1296_v58 = vrot.slane %v3301_v63, 4 }
 0x33f   :  { %v1303_v19 = vsel %vm431_vm8, %v1295_v2, %v1296_v58 }
 0x340   :  { %v1304_v55 = vsel %vm163_vm1, %v1282_v24, %v1303_v19 }
 0x341   :  { %1314 = vst [vmem:[#allocation3 + $0x90] sm:$0xff] %v1304_v55  ;;  %1493 = vperm.xlu1 %2441, %v37_v29   ;;  %1488 = vperm.xlu0 %2440, %v36_v31  }
 0x344   :  { %v1244_v37 = vpop.permute.xlu2 %1243 }
 0x345   :  { %v1256_v17 = vrot.slane %v1244_v37, 4 }
 0x347   :  { %v1263_v9 = vsel %vm431_vm8, %v1255_v42, %v1256_v17 }
 0x348   :  { %v1264_v47 = vsel %vm112_vm0, %v1242_v36, %v1263_v9 }
 0x349   :  { %1274 = vst [vmem:[#allocation3 + $0x50] sm:$0xff] %v1264_v47 }
 0x34b   :  { %v3316_v11 = vpop.permute.xlu0 %1279 }
 0x34c   :  { %v1294_v59 = vrot.slane %v3316_v11, 4  ;;  %v3319_v44 = vpop.permute.xlu2 %1393 }
 0x34e   :  { %v1301_v5 = vsel %vm431_vm8, %v1293_v27, %v1294_v59 }
 0x34f   :  { %v1302_v28 = vsel %vm163_vm1, %v1278_v45, %v1301_v5 }
 0x350   :  { %1313 = vst [vmem:[#allocation3 + $0x80] sm:$0xff] %v1302_v28 }
 0x353   :  { %v1354_v33 = vpop.permute.xlu1 %1353  ;;  %v1240_v50 = vpop.permute.xlu0 %1239 }
 0x354   :  { %v1254_v35 = vrot.slane %v1240_v50, 4  ;;  %v3325_v49 = vpop.permute.xlu2 %1287  ;;  %v1367_v45 = vrot.slane %v1354_v33, 4 }
 0x355   :  { %v1298_v41 = vrot.slane %v3325_v49, 4 }
 0x356   :  { %v1261_v15 = vsel %vm431_vm8, %v1253_v48, %v1254_v35 }
 0x357   :  { %v1262_v18 = vsel %vm112_vm0, %v1238_v22, %v1261_v15 }
 0x358   :  { %1273 = vst [vmem:[#allocation3 + $0x40] sm:$0xff] %v1262_v18 }
 0x35b   :  { %v1286_v57 = vpop.permute.xlu1 %1285  ;;  %v1390_v20 = vpop.permute.xlu0 %1389 }
 0x35c   :  { %v1297_v39 = vrot.slane %v1286_v57, 4  ;;  %v1250_v62 = vpop.permute.xlu2 %1249  ;;  %v1405_v27 = vrot.slane %v1390_v20, 4 }
 0x35d   :  { %v1259_v53 = vrot.slane %v1250_v62, 4 }
 0x35e   :  { %v1305_v38 = vsel %vm431_vm8, %v1297_v39, %v1298_v41  ;;  %v2412_v39 = vld [vmem:[#allocation3 + $0x84] sm:$0xf] }
 0x35f   :  { %v1306_v10 = vsel %vm163_vm1, %v1286_v57, %v1305_v38  ;;  %v2319_v57 = vld [vmem:[#allocation3 + $0x80] sm:$0xf] }
 0x360   :  { %1315 = vst [vmem:[#allocation3 + $0xa0] sm:$0xff] %v1306_v10 }
 0x363   :  { %v1248_v51 = vpop.permute.xlu1 %1247  ;;  %v1246_v16 = vpop.permute.xlu0 %1245 }
 0x364   :  { %v1258_v61 = vrot.slane %v1248_v51, 4  ;;  %v1257_v4 = vrot.slane %v1246_v16, 4  ;;  %v1400_v46 = vpop.permute.xlu2 %1399 }
 0x365   :  { %v1410_v6 = vrot.slane %v1400_v46, 4 }
 0x366   :  { %v1265_v40 = vsel %vm431_vm8, %v1257_v4, %v1258_v61 }
 0x367   :  { %v1266_v52 = vsel %vm112_vm0, %v1246_v16, %v1265_v40  ;;  %v2416_v35 = vld [vmem:[#allocation3 + $0xa4] sm:$0xf]  ;;  %v2321_v16 = vld [vmem:[#allocation3 + $0x90] sm:$0xf0] }
 0x368   :  { %1275 = vst [vmem:[#allocation3 + $0x60] sm:$0xff] %v1266_v52  ;;  %v2324_v46 = vor.u32 %v2412_v39, %v2321_v16 }
 0x36b   :  { %v1398_v13 = vpop.permute.xlu1 %1397  ;;  %v1290_v43 = vpop.permute.xlu0 %1289 }
 0x36c   :  { %v1409_v60 = vrot.slane %v1398_v13, 4  ;;  %v1360_v26 = vpop.permute.xlu2 %1359  ;;  %v1299_v29 = vrot.slane %v1290_v43, 4 }
 0x36d   :  { %v1370_v32 = vrot.slane %v1360_v26, 4 }
 0x36e   :  { %v1417_v54 = vsel %vm431_vm8, %v1409_v60, %v1410_v6 }
 0x36f   :  { %v1418_v21 = vsel %vm265_vm3, %v1398_v13, %v1417_v54  ;;  %v2303_v26 = vld [vmem:[#allocation3 + $0x60] sm:$0xf]  ;;  %v2408_v54 = vld [vmem:[#allocation3 + $0x64] sm:$0xf] }
 0x370   :  { %1427 = vst [vmem:[#allocation3 + $0xa8] sm:$0xff] %v1418_v21 }
 0x373   :  { %v1358_v25 = vpop.permute.xlu1 %1357  ;;  %v1252_v7 = vpop.permute.xlu0 %1251 }
 0x374   :  { %v1369_v8 = vrot.slane %v1358_v25, 4  ;;  %v1260_v34 = vrot.slane %v1252_v7, 4  ;;  %v1356_v1 = vpop.permute.xlu2 %1355  ;;  %v2287_v7 = vld [vmem:[#allocation3 + $0x40] sm:$0xf] }
 0x375   :  { %v1368_v14 = vrot.slane %v1356_v1, 4 }
 0x376   :  { %v1377_v22 = vsel %vm431_vm8, %v1369_v8, %v1370_v32  ;;  %v1267_v3 = vsel %vm431_vm8, %v1259_v53, %v1260_v34  ;;  %v2404_v53 = vld [vmem:[#allocation3 + $0x44] sm:$0xf]  ;;  %v2406_v32 = vld [vmem:[#allocation3 + $0x4c] sm:$0xf0]  ;;  %v1407_v8 = vrot.slane %v3319_v44, 4 }
 0x377   :  { %v1378_v0 = vsel %vm214_vm2, %v1358_v25, %v1377_v22  ;;  %v1268_v12 = vsel %vm112_vm0, %v1250_v62, %v1267_v3  ;;  %v1375_v30 = vsel %vm431_vm8, %v1367_v45, %v1368_v14  ;;  %v1365_v62 = vrot.slane %v3290_v56, 4  ;;  %v2289_v14 = vld [vmem:[#allocation3 + $0x50] sm:$0xf0] }
 0x378   :  { %1387 = vst [vmem:[#allocation3 + $0x68] sm:$0xff] %v1378_v0  ;;  %v1376_v23 = vsel %vm214_vm2, %v1354_v33, %v1375_v30  ;;  %v2335_v33 = vld [vmem:[#allocation3 + $0xa0] sm:$0xf]  ;;  %v2288_v45 = vor.u32 %v2406_v32, %v2287_v7  ;;  %v2292_v0 = vor.u32 %v2404_v53, %v2289_v14  ;;  %v2273_v30 = vld [vmem:[#allocation3 + $0x30] sm:$0xf0] }
 0x379   :  { %1276 = vst [vmem:[#allocation3 + $0x70] sm:$0xff] %v1268_v12  ;;  %v2402_v12 = vld [vmem:[#allocation3 + $0x2c] sm:$0xf0] }
 0x37a   :  { %1386 = vst [vmem:[#allocation3 + $0x58] sm:$0xff] %v1376_v23 }
 0x37b   :  { %v3344_v24 = vpop.permute.xlu1 %1291  ;;  %v1402_v2 = vpop.permute.xlu0 %1401 }
 0x37c   :  { %v1300_v31 = vrot.slane %v3344_v24, 4  ;;  %v1322_v19 = vpop.permute.xlu2 %1321  ;;  %v1411_v61 = vrot.slane %v1402_v2, 4 }
 0x37d   :  { %v1329_v55 = vrot.slane %v1322_v19, 4  ;;  %v2400_v19 = vld [vmem:[#allocation3 + $0x24] sm:$0xf] }
 0x37e   :  { %v1307_v36 = vsel %vm431_vm8, %v1299_v29, %v1300_v31  ;;  %v2271_v29 = vld [vmem:[#allocation3 + $0x20] sm:$0xf] }
 0x37f   :  { %v1308_v37 = vsel %vm163_vm1, %v1290_v43, %v1307_v36  ;;  %v1333_v42 = vsel %vm431_vm8, %v1294_v59, %v1329_v55  ;;  %v2343_v55 = vld [vmem:[#allocation3 + $0xa8] sm:$0xf] }
 0x380   :  { %1316 = vst [vmem:[#allocation3 + $0xb0] sm:$0xff] %v1308_v37  ;;  %v1334_v17 = vsel %vm163_vm1, %v3316_v11, %v1333_v42  ;;  %v2414_v11 = vld [vmem:[#allocation3 + $0x8c] sm:$0xf0]  ;;  %v2305_v52 = vld [vmem:[#allocation3 + $0x70] sm:$0xf0] }
 0x381   :  { %1345 = vst [vmem:[#allocation3 + $0x8] sm:$0xff] %v1334_v17  ;;  %v2320_v51 = vor.u32 %v2414_v11, %v2319_v57  ;;  %v2410_v40 = vld [vmem:[#allocation3 + $0x6c] sm:$0xf0]  ;;  %v2308_v25 = vor.u32 %v2408_v54, %v2305_v52  ;;  %v2417_v17 = vld [vmem:[#allocation3 + $0xac] sm:$0xf]  ;;  %v3377_v11 = vld [vmem:[%s3856_s3] sm:$0xff] }
 0x382   :  { %v2304_v21 = vor.u32 %v2410_v40, %v2303_v26  ;;  %v2311_v52 = vld [vmem:[#allocation3 + $0x68] sm:$0xf]  ;;  %v2297_v7 = vld [vmem:[#allocation3 + $0x58] sm:$0xf0] }
 0x383   :  { %v1392_v9 = vpop.permute.xlu1 %1391  ;;  %v3356_v47 = vpop.permute.xlu0 %1361 }
 0x384   :  { %v1406_v5 = vrot.slane %v1392_v9, 4  ;;  %v1371_v22 = vrot.slane %v3356_v47, 4 }
 0x386   :  { %v1413_v28 = vsel %vm431_vm8, %v1405_v27, %v1406_v5  ;;  %v2272_v27 = vor.u32 %v2402_v12, %v2271_v29  ;;  %v2276_v5 = vor.u32 %v2400_v19, %v2273_v30 }
 0x387   :  { %v1414_v50 = vsel %vm265_vm3, %v1390_v20, %v1413_v28  ;;  %v2418_v48 = vld [vmem:[#allocation3 + $0xac] sm:$0xf0]  ;;  %v2337_v15 = vld [vmem:[#allocation3 + $0xb0] sm:$0xf0] }
 0x388   :  { %1425 = vst [vmem:[#allocation3 + $0x88] sm:$0xff] %v1414_v50  ;;  %v2336_v59 = vor.u32 %v2418_v48, %v2335_v33  ;;  %v2340_v18 = vor.u32 %v2416_v35, %v2337_v15  ;;  %v2398_v50 = vld [vmem:[#allocation3 + $0xc] sm:$0xf0]  ;;  %v2257_v48 = vld [vmem:[#allocation3 + $0x10] sm:$0xf0] }
 0x389   :  { %v2255_v15 = vld [vmem:[#allocation3] sm:$0xf] }
 0x38a   :  { %1656 = vmatpush.bf16.msrb.mxu1 %v2336_v59  ;;  %1685 = vmatpush.bf16.msrb.mxu2 %v2340_v18  ;;  %v2396_v59 = vld [vmem:[#allocation3 + $0x4] sm:$0xf]  ;;  %v2256_v57 = vor.u32 %v2398_v50, %v2255_v15 }
 0x38b   :  { %v1404_v38 = vpop.permute.xlu1 %1403  ;;  %v1352_v10 = vpop.permute.xlu0 %1351  ;;  %v2260_v39 = vor.u32 %v2396_v59, %v2257_v48 }
 0x38c   :  { %v1412_v4 = vrot.slane %v1404_v38, 4  ;;  %v1366_v20 = vrot.slane %v1352_v10, 4 }
 0x38e   :  { %v1419_v13 = vsel %vm431_vm8, %v1411_v61, %v1412_v4  ;;  %v1373_v43 = vsel %vm431_vm8, %v1365_v62, %v1366_v20  ;;  %1657 = vmatpush.bf16.msrb.mxu1 %v2320_v51  ;;  %1686 = vmatpush.bf16.msrb.mxu2 %v2324_v46 }
 0x38f   :  { %v1420_v6 = vsel %vm265_vm3, %v1402_v2, %v1419_v13  ;;  %v1374_v60 = vsel %vm214_vm2, %v3290_v56, %v1373_v43  ;;  %v2327_v16 = vld [vmem:[#allocation3 + $0x88] sm:$0xf]  ;;  %v2413_v61 = vld [vmem:[#allocation3 + $0x8c] sm:$0xf] }
 0x390   :  { %1428 = vst [vmem:[#allocation3 + $0xb8] sm:$0xff] %v1420_v6  ;;  %v2409_v13 = vld [vmem:[#allocation3 + $0x6c] sm:$0xf] }
 0x391   :  { %1385 = vst [vmem:[#allocation3 + $0x48] sm:$0xff] %v1374_v60 }
 0x392   :  { %1658 = vmatpush.bf16.msrb.mxu1 %v2304_v21  ;;  %1687 = vmatpush.bf16.msrb.mxu2 %v2308_v25  ;;  %v2407_v25 = vld [vmem:[#allocation3 + $0x54] sm:$0xf0] }
 0x393   :  { %v1364_v34 = vpop.permute.xlu1 %1363  ;;  %v1396_v1 = vpop.permute.xlu0 %1395 }
 0x394   :  { %v1372_v56 = vrot.slane %v1364_v34, 4  ;;  %v1408_v3 = vrot.slane %v1396_v1, 4 }
 0x396   :  { %v1379_v23 = vsel %vm431_vm8, %v1371_v22, %v1372_v56  ;;  %v1415_v2 = vsel %vm431_vm8, %v1407_v8, %v1408_v3  ;;  %1659 = vmatpush.bf16.msrb.mxu1 %v2288_v45  ;;  %1688 = vmatpush.bf16.msrb.mxu2 %v2292_v0  ;;  %v2263_v22 = vld [vmem:[#allocation3 + $0x8] sm:$0xf]  ;;  %v2397_v3 = vld [vmem:[#allocation3 + $0xc] sm:$0xf] }
 0x397   :  { %v1380_v36 = vsel %vm214_vm2, %v3356_v47, %v1379_v23  ;;  %v1416_v37 = vsel %vm265_vm3, %v3319_v44, %v1415_v2  ;;  %v2419_v42 = vld [vmem:[#allocation3 + $0xb4] sm:$0xf0]  ;;  %v2345_v9 = vld [vmem:[#allocation3 + $0xb8] sm:$0xf0]  ;;  %v2394_v23 = vld [vmem:[%s3856_s3 + $0x10] sm:$0xff] }
 0x398   :  { %1388 = vst [vmem:[#allocation3 + $0x78] sm:$0xff] %v1380_v36  ;;  %v2344_v28 = vor.u32 %v2419_v42, %v2343_v55  ;;  %v2348_v33 = vor.u32 %v2417_v17, %v2345_v9  ;;  %v2295_v26 = vld [vmem:[#allocation3 + $0x48] sm:$0xf]  ;;  %v2405_v54 = vld [vmem:[#allocation3 + $0x4c] sm:$0xf]  ;;  %v2395_v2 = vld [vmem:[%s3856_s3 + $0x18] sm:$0xff] }
 0x399   :  { %1426 = vst [vmem:[#allocation3 + $0x98] sm:$0xff] %v1416_v37  ;;  %v2296_v53 = vor.u32 %v2407_v25, %v2295_v26  ;;  %v2300_v32 = vor.u32 %v2405_v54, %v2297_v7 }
 0x39a   :  { %1660 = vmatpush.bf16.msrb.mxu1 %v2272_v27  ;;  %1689 = vmatpush.bf16.msrb.mxu2 %v2276_v5  ;;  %v1469_v27 = vpop.permute.xlu2 %1468 }
 0x39b   :  { %1714 = vmatpush.bf16.msrb.mxu3 %v2344_v28  ;;  %1743 = vmatpush.bf16.msra.mxu0 %v2348_v33  ;;  %v1328_v35 = vpop.permute.xlu1 %1327  ;;  %v1326_v47 = vpop.permute.xlu0 %1325 }
 0x39c   :  { %v1332_v44 = vrot.slane %v1328_v35, 4  ;;  %v1331_v18 = vrot.slane %v1326_v47, 4 }
 0x39e   :  { %v1339_v62 = vsel %vm431_vm8, %v1300_v31, %v1332_v44  ;;  %v1337_v38 = vsel %vm431_vm8, %v1298_v41, %v1331_v18  ;;  %1661 = vmatpush.bf16.msrb.mxu1 %v2256_v57  ;;  %1690 = vmatpush.bf16.msrb.mxu2 %v2260_v39 }
 0x39f   :  { %v1340_v10 = vsel %vm163_vm1, %v3344_v24, %v1339_v62  ;;  %v1338_v51 = vsel %vm163_vm1, %v3325_v49, %v1337_v38  ;;  %v2411_v46 = vld [vmem:[#allocation3 + $0x74] sm:$0xf0]  ;;  %v2313_v24 = vld [vmem:[#allocation3 + $0x78] sm:$0xf0] }
 0x3a0   :  { %1348 = vst [vmem:[#allocation3 + $0x38] sm:$0xff] %v1340_v10  ;;  %v2415_v4 = vld [vmem:[#allocation3 + $0x94] sm:$0xf0]  ;;  %v2329_v20 = vld [vmem:[#allocation3 + $0x98] sm:$0xf0]  ;;  %v2312_v43 = vor.u32 %v2411_v46, %v2311_v52  ;;  %v2316_v6 = vor.u32 %v2409_v13, %v2313_v24 }
 0x3a1   :  { %1347 = vst [vmem:[#allocation3 + $0x28] sm:$0xff] %v1338_v51  ;;  %2349 = vmatmul.msk.bf16.vlgmr.msrb.gmra.mxu1 %vm1641_vm15, %v3377_v11  ;;  %2353 = vmatmul.msk.bf16.vlgmr.msrb.gmra.mxu2 %vm1641_vm15, %v3377_v11  ;;  %v2328_v41 = vor.u32 %v2415_v4, %v2327_v16  ;;  %v2332_v31 = vor.u32 %v2413_v61, %v2329_v20 }
 0x3a2   :  { %2420 = vmatpush.bf16.msra.mxu1 %v2348_v33 }
 0x3a3   :  { %1715 = vmatpush.bf16.msrb.mxu3 %v2328_v41  ;;  %1744 = vmatpush.bf16.msra.mxu0 %v2332_v31  ;;  %v1324_v49 = vpop.permute.xlu0 %1323  ;;  %v1464_v29 = vpop.permute.xlu1 %1463 }
 0x3a4   :  { %v1330_v40 = vrot.slane %v1324_v49, 4  ;;  %v3481_v49 = vpop.permute.xlu2 %1483 }
 0x3a6   :  { %2421 = vmatpush.bf16.msra.mxu1 %v2332_v31  ;;  %v1335_v60 = vsel %vm431_vm8, %v1296_v58, %v1330_v40 }
 0x3a7   :  { %v1336_v21 = vsel %vm163_vm1, %v3301_v63, %v1335_v60  ;;  %1716 = vmatpush.bf16.msrb.mxu3 %v2312_v43  ;;  %1745 = vmatpush.bf16.msra.mxu0 %v2316_v6  ;;  %v2403_v8 = vld [vmem:[#allocation3 + $0x34] sm:$0xf0]  ;;  %v2281_v45 = vld [vmem:[#allocation3 + $0x38] sm:$0xf0]  ;;  %v2393_v63 = vld [vmem:[%s3856_s3 + $0x8] sm:$0xff] }
 0x3a8   :  { %1346 = vst [vmem:[#allocation3 + $0x18] sm:$0xff] %v1336_v21  ;;  %v2279_v34 = vld [vmem:[#allocation3 + $0x28] sm:$0xf]  ;;  %v2401_v1 = vld [vmem:[#allocation3 + $0x2c] sm:$0xf] }
 0x3a9   :  { %v2280_v58 = vor.u32 %v2403_v8, %v2279_v34  ;;  %v2284_v14 = vor.u32 %v2401_v1, %v2281_v45 }
 0x3aa   :  { %2422 = vmatpush.bf16.msra.mxu1 %v2316_v6 }
 0x3ab   :  { %1717 = vmatpush.bf16.msrb.mxu3 %v2296_v53  ;;  %1746 = vmatpush.bf16.msra.mxu0 %v2300_v32  ;;  %v1474_v47 = vpop.permute.xlu0 %1473  ;;  %v3459_v38 = vpop.permute.xlu1 %1478 }
 0x3ae   :  { %2423 = vmatpush.bf16.msra.mxu1 %v2300_v32 }
 0x3af   :  { %1718 = vmatpush.bf16.msrb.mxu3 %v2280_v58  ;;  %1747 = vmatpush.bf16.msra.mxu0 %v2284_v14  ;;  %v2399_v56 = vld [vmem:[#allocation3 + $0x14] sm:$0xf0]  ;;  %v2265_v0 = vld [vmem:[#allocation3 + $0x18] sm:$0xf0] }
 0x3b0   :  { %v2264_v12 = vor.u32 %v2399_v56, %v2263_v22  ;;  %v2268_v30 = vor.u32 %v2397_v3, %v2265_v0 }
 0x3b1   :  { %2350 = vmatmul.msk.bf16.gmra.mxu1 %vm1641_vm15, %v2393_v63  ;;  %2354 = vmatmul.msk.bf16.gmra.mxu2 %vm1641_vm15, %v2393_v63 }
 0x3b2   :  { %2424 = vmatpush.bf16.msra.mxu1 %v2284_v14 }
 0x3b3   :  { %1719 = vmatpush.bf16.msrb.mxu3 %v2264_v12  ;;  %1748 = vmatpush.bf16.msra.mxu0 %v2268_v30  ;;  %v3500_v7 = vpop.permute.xlu0 %1488 }
 0x3b6   :  { %2425 = vmatpush.bf16.msra.mxu1 %v2268_v30  ;;  %2357 = vmatmul.msk.bf16.vlgmr.msrb.gmra.mxu3 %vm1641_vm15, %v3377_v11 }
 0x3b7   :  { %2361 = vmatmul.msk.bf16.vlgmr.msra.gmra.mxu0 %vm1641_vm15, %v3377_v11 }
 0x3c1   :  { %2351 = vmatmul.msk.bf16.gmra.mxu1 %vm1641_vm15, %v2394_v23  ;;  %2355 = vmatmul.msk.bf16.gmra.mxu2 %vm1641_vm15, %v2394_v23 }
 0x3c6   :  { %2358 = vmatmul.msk.bf16.gmra.mxu3 %vm1641_vm15, %v2393_v63 }
 0x3c7   :  { %2362 = vmatmul.msk.bf16.gmra.mxu0 %vm1641_vm15, %v2393_v63 }
 0x3d1   :  { %2352 = vmatmul.msk.bf16.gmra.mxu1 %vm1641_vm15, %v2395_v2  ;;  %2356 = vmatmul.msk.bf16.gmra.mxu2 %vm1641_vm15, %v2395_v2 }
 0x3d6   :  { %2359 = vmatmul.msk.bf16.gmra.mxu3 %vm1641_vm15, %v2394_v23 }
 0x3d7   :  { %2363 = vmatmul.msk.bf16.gmra.mxu0 %vm1641_vm15, %v2394_v23 }
 0x3e1   :  { %2364 = vmatmul.msk.bf16.vlgmr.msra.gmra.mxu1 %vm1641_vm15, %v2395_v2 }
 0x3e6   :  { %2360 = vmatmul.msk.bf16.gmra.mxu3 %vm1641_vm15, %v2395_v2 }
 0x41e   :  { %v1663_v19 = vpop.f32.mrf.mxu1 }
 0x41f   :  { %v3423_v55 = vadd.f32 %v1663_v19, %v1464_v29 }
 0x421   :  { %v1770_v36 = vmax.f32 %v3423_v55, 0.0 }
 0x423   :  { %1834 = vrot.lane.b32.xlu0 %v1770_v36, %s2470_s1 }
 0x424   :  { %v1692_v37 = vpop.f32.mrf.mxu2 }
 0x425   :  { %v3429_v42 = vadd.f32 %v1692_v37, %v1464_v29  ;;  %v1494_v37 = vpop.permute.xlu1 %1493 }
 0x426   :  { %v1665_v17 = vpop.f32.mrf.mxu1 }
 0x427   :  { %v1771_v9 = vmax.f32 %v3429_v42, 0.0  ;;  %v3435_v5 = vadd.f32 %v1665_v17, %v1469_v27 }
 0x429   :  { %1836 = vrot.lane.b32.xlu1 %v1771_v9, %s2470_s1  ;;  %v1774_v48 = vmax.f32 %v3435_v5, 0.0 }
 0x42c   :  { %v1694_v28 = vpop.f32.mrf.mxu2 }
 0x42d   :  { %v3437_v33 = vadd.f32 %v1694_v28, %v1469_v27 }
 0x42e   :  { %v1668_v50 = vpop.f32.mrf.mxu1 }
 0x42f   :  { %v1775_v35 = vmax.f32 %v3437_v33, 0.0  ;;  %v3447_v15 = vadd.f32 %v1668_v50, %v1474_v47 }
 0x431   :  { %1840 = vrot.lane.b32.xlu2 %v1775_v35, %s2470_s1  ;;  %1838 = vrot.lane.b32.xlu1 %v1774_v48, %s2470_s1  ;;  %v1778_v39 = vmax.f32 %v3447_v15, 0.0 }
 0x434   :  { %v1750_v59 = vpop.f32.mrf.mxu0  ;;  %v1697_v44 = vpop.f32.mrf.mxu2 }
 0x435   :  { %v3449_v18 = vadd.f32 %v1697_v44, %v1474_v47  ;;  %v3483_v40 = vadd.f32 %v1750_v59, %v1464_v29 }
 0x436   :  { %v1670_v57 = vpop.f32.mrf.mxu1 }
 0x437   :  { %v1779_v11 = vmax.f32 %v3449_v18, 0.0  ;;  %v3462_v10 = vadd.f32 %v1670_v57, %v3459_v38  ;;  %v1773_v60 = vmax.f32 %v3483_v40, 0.0  ;;  %v3701_v18 = vld [vmem:[%s3857_s4 + $0x30] sm:$0xff] }
 0x439   :  { %v1721_v62 = vpop.f32.mrf.mxu3  ;;  %1844 = vrot.lane.b32.xlu0 %v1779_v11, %s2470_s1  ;;  %1842 = vrot.lane.b32.xlu2 %v1778_v39, %s2470_s1  ;;  %v1782_v41 = vmax.f32 %v3462_v10, 0.0  ;;  %v3711_v10 = vld [vmem:[%s3857_s4 + $0x38] sm:$0xff] }
 0x43a   :  { %v3464_v51 = vadd.f32 %v1721_v62, %v1464_v29 }
 0x43c   :  { %v1752_v16 = vpop.f32.mrf.mxu0  ;;  %v1699_v61 = vpop.f32.mrf.mxu2  ;;  %v1772_v31 = vmax.f32 %v3464_v51, 0.0  ;;  %v3762_v51 = vld [vmem:[%s3857_s4 + $0x58] sm:$0xff] }
 0x43d   :  { %v3467_v4 = vadd.f32 %v1699_v61, %v3459_v38  ;;  %v3510_v8 = vadd.f32 %v1752_v16, %v1469_v27  ;;  %v1499_v16 = vpop.permute.xlu2 %1498 }
 0x43e   :  { %v1673_v20 = vpop.f32.mrf.mxu1 }
 0x43f   :  { %v1783_v46 = vmax.f32 %v3467_v4, 0.0  ;;  %v3486_v13 = vadd.f32 %v1673_v20, %v3481_v49  ;;  %v3876_v14 = vmax.f32 %v3510_v8, 0.0  ;;  %v3721_v4 = vld [vmem:[%s3857_s4 + $0x40] sm:$0xff] }
 0x441   :  { %v1723_v24 = vpop.f32.mrf.mxu3  ;;  %1846 = vrot.lane.b32.xlu0 %v1782_v41, %s2470_s1  ;;  %1971 = vrot.lane.b32.xlu2 %v1772_v31, %s2470_s1  ;;  %v1786_v54 = vmax.f32 %v3486_v13, 0.0 }
 0x442   :  { %1848 = vrot.lane.b32.xlu1 %v1783_v46, %s2470_s1  ;;  %v3505_v53 = vadd.f32 %v1723_v24, %v1469_v27 }
 0x444   :  { %v1755_v52 = vpop.f32.mrf.mxu0  ;;  %v1702_v43 = vpop.f32.mrf.mxu2  ;;  %v3877_v1 = vmax.f32 %v3505_v53, 0.0 }
 0x445   :  { %v3489_v6 = vadd.f32 %v1702_v43, %v3481_v49  ;;  %v3524_v22 = vadd.f32 %v1755_v52, %v1474_v47 }
 0x446   :  { %v1675_v21 = vpop.f32.mrf.mxu1 }
 0x447   :  { %v1787_v26 = vmax.f32 %v3489_v6, 0.0  ;;  %v3508_v32 = vadd.f32 %v1675_v21, %v3500_v7  ;;  %v3872_v12 = vmax.f32 %v3524_v22, 0.0 }
 0x449   :  { %v1726_v25 = vpop.f32.mrf.mxu3  ;;  %1973 = vrot.lane.b32.xlu0 %v1773_v60, %s2470_s1  ;;  %1852 = vrot.lane.b32.xlu2 %v1787_v26, %s2470_s1  ;;  %v1790_v45 = vmax.f32 %v3508_v32, 0.0 }
 0x44a   :  { %1850 = vrot.lane.b32.xlu1 %v1786_v54, %s2470_s1  ;;  %v3529_v3 = vadd.f32 %v1726_v25, %v1474_v47 }
 0x44c   :  { %v1757_v34 = vpop.f32.mrf.mxu0  ;;  %v1704_v58 = vpop.f32.mrf.mxu2  ;;  %v3873_v2 = vmax.f32 %v3529_v3, 0.0 }
 0x44d   :  { %v3527_v56 = vadd.f32 %v1704_v58, %v3500_v7  ;;  %v3563_v61 = vadd.f32 %v1757_v34, %v3459_v38 }
 0x44e   :  { %v1678_v23 = vpop.f32.mrf.mxu1 }
 0x44f   :  { %v1791_v30 = vmax.f32 %v3527_v56, 0.0  ;;  %v3543_v17 = vadd.f32 %v1678_v23, %v1494_v37  ;;  %v3862_v52 = vmax.f32 %v3563_v61, 0.0 }
 0x451   :  { %v1728_v63 = vpop.f32.mrf.mxu3  ;;  %1975 = vrot.lane.b32.xlu0 %v3877_v1, %s2470_s1  ;;  %1854 = vrot.lane.b32.xlu2 %v1790_v45, %s2470_s1  ;;  %v3875_v50 = vmax.f32 %v3543_v17, 0.0 }
 0x452   :  { %1977 = vrot.lane.b32.xlu1 %v3876_v14, %s2470_s1  ;;  %v3546_v27 = vadd.f32 %v1728_v63, %v3459_v38 }
 0x454   :  { %v1760_v0 = vpop.f32.mrf.mxu0  ;;  %v1707_v29 = vpop.f32.mrf.mxu2  ;;  %v3868_v47 = vmax.f32 %v3546_v27, 0.0 }
 0x455   :  { %v3548_v28 = vadd.f32 %v1707_v29, %v1494_v37  ;;  %v3588_v58 = vadd.f32 %v1760_v0, %v3481_v49 }
 0x456   :  { %v1680_v57 = vpop.f32.mrf.mxu1 }
 0x457   :  { %v3874_v59 = vmax.f32 %v3548_v28, 0.0  ;;  %v3568_v24 = vadd.f32 %v1680_v57, %v1499_v16 }
 0x459   :  { %v1731_v19 = vpop.f32.mrf.mxu3  ;;  %1856 = vrot.lane.b32.xlu0 %v1791_v30, %s2470_s1  ;;  %1981 = vrot.lane.b32.xlu2 %v3872_v12, %s2470_s1  ;;  %v3863_v21 = vmax.f32 %v3568_v24, 0.0  ;;  %v3644_v12 = vld [vmem:[%s3857_s4 + $0x8] sm:$0xff] }
 0x45a   :  { %1979 = vrot.lane.b32.xlu1 %v3873_v2, %s2470_s1  ;;  %v3583_v38 = vadd.f32 %v1731_v19, %v3481_v49 }
 0x45c   :  { %v1762_v44 = vpop.f32.mrf.mxu0  ;;  %v3861_v63 = vmax.f32 %v3583_v38, 0.0  ;;  %v1709_v57 = vpop.f32.mrf.mxu2 }
 0x45d   :  { %v3566_v20 = vadd.f32 %v1762_v44, %v3500_v7  ;;  %v3867_v44 = vmax.f32 %v3588_v58, 0.0  ;;  %v3602_v49 = vadd.f32 %v1709_v57, %v1499_v16  ;;  %v39_v57 = vld [vmem:[%s3858_s5 + $0x70] sm:$0x1] }
 0x45e   :  { %v1765_v23 = vpop.f32.mrf.mxu1 }
 0x45f   :  { %v3860_v43 = vmax.f32 %v3566_v20, 0.0  ;;  %v3604_v0 = vadd.f32 %v1765_v23, %v1494_v37 }
 0x461   :  { %v1733_v62 = vpop.f32.mrf.mxu3  ;;  %1858 = vrot.lane.b32.xlu0 %v3875_v50, %s2470_s1  ;;  %1983 = vrot.lane.b32.xlu2 %v3868_v47, %s2470_s1 }
 0x462   :  { %1860 = vrot.lane.b32.xlu1 %v3874_v59, %s2470_s1  ;;  %v3607_v19 = vadd.f32 %v1733_v62, %v3500_v7 }
 0x469   :  { %v1736_v25 = vpop.f32.mrf.mxu3  ;;  %1985 = vrot.lane.b32.xlu0 %v3862_v52, %s2470_s1  ;;  %1993 = vrot.lane.b32.xlu2 %v3860_v43, %s2470_s1  ;;  %v3865_v43 = vmax.f32 %v3604_v0, 0.0 }
 0x46a   :  { %1862 = vrot.lane.b32.xlu1 %v3863_v21, %s2470_s1  ;;  %v3585_v34 = vadd.f32 %v1736_v25, %v1494_v37  ;;  %v3869_v25 = vmax.f32 %v3602_v49, 0.0  ;;  %v1767_v21 = vpop.f32.mrf.mxu1 }
 0x46b   :  { %v3623_v37 = vadd.f32 %v1767_v21, %v1499_v16 }
 0x46c   :  { %v3864_v29 = vmax.f32 %v3585_v34, 0.0 }
 0x46d   :  { %v3871_v23 = vmax.f32 %v3623_v37, 0.0 }
 0x471   :  { %1987 = vrot.lane.b32.xlu0 %v3861_v63, %s2470_s1  ;;  %1995 = vrot.lane.b32.xlu2 %v3864_v29, %s2470_s1  ;;  %v3866_v63 = vmax.f32 %v3607_v19, 0.0  ;;  %v1738_v52 = vpop.f32.mrf.mxu3 }
 0x472   :  { %1989 = vrot.lane.b32.xlu1 %v3867_v44, %s2470_s1  ;;  %v3621_v7 = vadd.f32 %v1738_v52, %v1499_v16 }
 0x474   :  { %v3870_v62 = vmax.f32 %v3621_v7, 0.0 }
 0x479   :  { %1997 = vrot.lane.b32.xlu0 %v3865_v43, %s2470_s1  ;;  %1864 = vrot.lane.b32.xlu2 %v3869_v25, %s2470_s1 }
 0x47a   :  { %1991 = vrot.lane.b32.xlu1 %v3866_v63, %s2470_s1 }
 0x481   :  { %1999 = vrot.lane.b32.xlu0 %v3870_v62, %s2470_s1 }
 0x482   :  { %2001 = vrot.lane.b32.xlu1 %v3871_v23, %s2470_s1 }
 0x48a   :  { %2096 = vperm.xlu1 %2441, %v39_v57  }
 0x48b   :  { %v1841_v52 = vpop.permute.xlu2 %1840 }
 0x48c   :  { %v1893_v55 = vmax.f32 %v1775_v35, %v1841_v52 }
 0x493   :  { %v1843_v16 = vpop.permute.xlu2 %1842 }
 0x495   :  { %v1835_v43 = vpop.permute.xlu0 %1834 }
 0x49b   :  { %v3636_v21 = vpop.permute.xlu2 %1971  ;;  %v1837_v29 = vpop.permute.xlu1 %1836 }
 0x49c   :  { %v1866_v62 = vsel %vm112_vm0, %v1835_v43, %v1837_v29  ;;  %v1891_v23 = vmax.f32 %v1771_v9, %v1837_v29  ;;  %v3654_v43 = vld [vmem:[%s3857_s4] sm:$0xff]  ;;  %v3662_v29 = vld [vmem:[%s3857_s4 + $0x10] sm:$0xff] }
 0x49d   :  { %v1890_v50 = vmax.f32 %v1770_v36, %v1866_v62 }
 0x49e   :  { %v1907_v42 = vmul.f32 %v1891_v23, %v3644_v12  ;;  %v3672_v23 = vld [vmem:[%s3857_s4 + $0x18] sm:$0xff] }
 0x49f   :  { %v1909_v35 = vmul.f32 %v1893_v55, %v3672_v23 }
 0x4a0   :  { %v1922_v36 = vsel %vm112_vm0, %v1907_v42, 0.0 }
 0x4a3   :  { %v1853_v63 = vpop.permute.xlu2 %1852  ;;  %v1839_v25 = vpop.permute.xlu1 %1838 }
 0x4a4   :  { %v1867_v57 = vsel %vm112_vm0, %v1839_v25, %v1841_v52  ;;  %v1906_v25 = vmul.f32 %v1890_v50, %v3654_v43  ;;  %v3683_v52 = vld [vmem:[%s3857_s4 + $0x20] sm:$0xff] }
 0x4a5   :  { %v1892_v9 = vmax.f32 %v1774_v48, %v1867_v57 }
 0x4a6   :  { %v1923_v1 = vadd.f32 %v1922_v36, %v1906_v25  ;;  %v3691_v25 = vld [vmem:[%s3857_s4 + $0x28] sm:$0xff] }
 0x4a7   :  { %v1908_v5 = vmul.f32 %v1892_v9, %v3662_v29 }
 0x4ab   :  { %v1845_v44 = vpop.permute.xlu0 %1844  ;;  %v1855_v47 = vpop.permute.xlu2 %1854 }
 0x4ac   :  { %v1868_v62 = vsel %vm112_vm0, %v1843_v16, %v1845_v44  ;;  %v1924_v16 = vadd.f32 %v1923_v1, %v1908_v5  ;;  %v1895_v42 = vmax.f32 %v1779_v11, %v1845_v44 }
 0x4ad   :  { %v1894_v50 = vmax.f32 %v1778_v39, %v1868_v62  ;;  %v1925_v39 = vsel %vm112_vm0, %v1909_v35, 0.0 }
 0x4ae   :  { %v1926_v55 = vadd.f32 %v1925_v39, %v1924_v16  ;;  %v1911_v1 = vmul.f32 %v1895_v42, %v3691_v25 }
 0x4af   :  { %v1910_v15 = vmul.f32 %v1894_v50, %v3683_v52 }
 0x4b0   :  { %v1928_v35 = vsel %vm112_vm0, %v1911_v1, 0.0 }
 0x4b3   :  { %v1847_v2 = vpop.permute.xlu0 %1846  ;;  %v3647_v59 = vpop.permute.xlu2 %1981 }
 0x4b4   :  { %v1849_v14 = vpop.permute.xlu1 %1848 }
 0x4b5   :  { %v1869_v9 = vsel %vm112_vm0, %v1847_v2, %v1849_v14  ;;  %v1927_v2 = vadd.f32 %v1926_v55, %v1910_v15  ;;  %v1897_v5 = vmax.f32 %v1783_v46, %v1849_v14  ;;  %v1899_v14 = vmax.f32 %v1787_v26, %v1853_v63  ;;  %v3728_v15 = vld [vmem:[%s3857_s4 + $0x48] sm:$0xff] }
 0x4b6   :  { %v1896_v36 = vmax.f32 %v1782_v41, %v1869_v9 }
 0x4b7   :  { %v1929_v16 = vadd.f32 %v1928_v35, %v1927_v2  ;;  %v1913_v9 = vmul.f32 %v1897_v5, %v3711_v10  ;;  %v1915_v2 = vmul.f32 %v1899_v14, %v3728_v15 }
 0x4b8   :  { %v1912_v41 = vmul.f32 %v1896_v36, %v3701_v18 }
 0x4b9   :  { %v1931_v36 = vsel %vm112_vm0, %v1913_v9, 0.0 }
 0x4ba   :  { %v1930_v46 = vadd.f32 %v1929_v16, %v1912_v41 }
 0x4bb   :  { %v1974_v48 = vpop.permute.xlu0 %1973  ;;  %v3675_v57 = vpop.permute.xlu2 %1983 }
 0x4bc   :  { %v1851_v33 = vpop.permute.xlu1 %1850  ;;  %v2028_v13 = vmax.f32 %v1773_v60, %v1974_v48  ;;  %v2003_v6 = vsel %vm112_vm0, %v3636_v21, %v1974_v48  ;;  %v1932_v26 = vadd.f32 %v1931_v36, %v1930_v46  ;;  %v3746_v60 = vld [vmem:[%s3857_s4 + $0x50] sm:$0xff] }
 0x4bd   :  { %v1870_v50 = vsel %vm112_vm0, %v1851_v33, %v1853_v63 }
 0x4be   :  { %v1898_v42 = vmax.f32 %v1786_v54, %v1870_v50  ;;  %v2044_v21 = vmul.f32 %v2028_v13, %v3644_v12  ;;  %v3881_v12 = vmax.f32 %v3510_v8, 0.0  ;;  %v3883_v8 = vmax.f32 %v3548_v28, 0.0 }
 0x4bf   :  { %v3885_v28 = vmax.f32 %v3524_v22, 0.0  ;;  %v1816_v22 = vld [vmem:[%s3857_s4 + $0x70] sm:$0xff] }
 0x4c0   :  { %v1914_v54 = vmul.f32 %v1898_v42, %v3721_v4  ;;  %v2059_v16 = vsel %vm112_vm0, %v2044_v21, 0.0 }
 0x4c2   :  { %v1933_v48 = vadd.f32 %v1932_v26, %v1914_v54 }
 0x4c3   :  { %v1976_v11 = vpop.permute.xlu0 %1975  ;;  %v3703_v44 = vpop.permute.xlu2 %1993 }
 0x4c4   :  { %v1978_v62 = vpop.permute.xlu1 %1977 }
 0x4c5   :  { %v2004_v40 = vsel %vm112_vm0, %v1976_v11, %v1978_v62  ;;  %v1934_v11 = vsel %vm112_vm0, %v1915_v2, 0.0 }
 0x4cb   :  { %v1857_v33 = vpop.permute.xlu0 %1856  ;;  %v3739_v1 = vpop.permute.xlu2 %1995 }
 0x4cc   :  { %v1871_v39 = vsel %vm112_vm0, %v1855_v47, %v1857_v33  ;;  %v1980_v55 = vpop.permute.xlu1 %1979  ;;  %v2027_v47 = vmax.f32 %v1772_v31, %v2003_v6  ;;  %v1901_v32 = vmax.f32 %v1791_v30, %v1857_v33  ;;  %v1935_v31 = vadd.f32 %v1934_v11, %v1933_v48  ;;  %v1815_v6 = vld [vmem:[%s3857_s4 + $0x68] sm:$0xff] }
 0x4cd   :  { %v1900_v63 = vmax.f32 %v1790_v45, %v1871_v39  ;;  %v3880_v45 = vmax.f32 %v3505_v53, 0.0  ;;  %v2030_v53 = vmax.f32 %v3881_v12, %v1978_v62  ;;  %v2005_v42 = vsel %vm112_vm0, %v1980_v55, %v3647_v59 }
 0x4ce   :  { %v2043_v35 = vmul.f32 %v2027_v47, %v3654_v43  ;;  %v1917_v30 = vmul.f32 %v1901_v32, %v3762_v51  ;;  %v3772_v43 = vld [vmem:[%s3857_s4 + $0x60] sm:$0xff]  ;;  %v3882_v33 = vmax.f32 %v3543_v17, 0.0  ;;  %v3884_v39 = vmax.f32 %v3529_v3, 0.0 }
 0x4cf   :  { %v2029_v5 = vmax.f32 %v3880_v45, %v2004_v40  ;;  %v1916_v50 = vmul.f32 %v1900_v63, %v3746_v60  ;;  %v2032_v40 = vmax.f32 %v3885_v28, %v3647_v59  ;;  %v3886_v3 = vmax.f32 %v3602_v49, 0.0  ;;  %v1817_v45 = vld [vmem:[%s3857_s4 + $0x78] sm:$0xff] }
 0x4d0   :  { %v2060_v54 = vadd.f32 %v2059_v16, %v2043_v35  ;;  %v2031_v55 = vmax.f32 %v3884_v39, %v2005_v42  ;;  %v1937_v63 = vsel %vm112_vm0, %v1917_v30, 0.0  ;;  %v3888_v35 = vmax.f32 %v3568_v24, 0.0 }
 0x4d1   :  { %v2045_v46 = vmul.f32 %v2029_v5, %v3662_v29  ;;  %v1936_v14 = vadd.f32 %v1935_v31, %v1916_v50  ;;  %v2046_v29 = vmul.f32 %v2030_v53, %v3672_v23  ;;  %v2048_v31 = vmul.f32 %v2032_v40, %v3691_v25 }
 0x4d2   :  { %v2047_v32 = vmul.f32 %v2031_v55, %v3683_v52  ;;  %v3887_v52 = vmax.f32 %v3546_v27, 0.0  ;;  %v3889_v42 = vmax.f32 %v3563_v61, 0.0  ;;  %v3890_v55 = vmax.f32 %v3583_v38, 0.0 }
 0x4d3   :  { %v1859_v41 = vpop.permute.xlu0 %1858  ;;  %v1865_v36 = vpop.permute.xlu2 %1864  ;;  %v2061_v17 = vadd.f32 %v2060_v54, %v2045_v46  ;;  %v1938_v2 = vadd.f32 %v1937_v63, %v1936_v14  ;;  %v2062_v11 = vsel %vm112_vm0, %v2046_v29, 0.0  ;;  %v2065_v27 = vsel %vm112_vm0, %v2048_v31, 0.0 }
 0x4d4   :  { %v1861_v56 = vpop.permute.xlu1 %1860  ;;  %v1905_v47 = vmax.f32 %v3886_v3, %v1865_v36 }
 0x4d5   :  { %v1872_v9 = vsel %vm112_vm0, %v1859_v41, %v1861_v56  ;;  %v1903_v62 = vmax.f32 %v3883_v8, %v1861_v56  ;;  %v2063_v49 = vadd.f32 %v2062_v11, %v2061_v17  ;;  %v3892_v17 = vmax.f32 %v3566_v20, 0.0 }
 0x4d6   :  { %v1902_v13 = vmax.f32 %v3882_v33, %v1872_v9  ;;  %v1921_v56 = vmul.f32 %v1905_v47, %v1817_v45  ;;  %v3894_v20 = vmax.f32 %v3604_v0, 0.0  ;;  %v3896_v0 = vmax.f32 %v3623_v37, 0.0 }
 0x4d7   :  { %v1919_v21 = vmul.f32 %v1903_v62, %v1815_v6  ;;  %v2064_v12 = vadd.f32 %v2063_v49, %v2047_v32 }
 0x4d8   :  { %v1918_v26 = vmul.f32 %v1902_v13, %v3772_v43  ;;  %v1943_v24 = vsel %vm112_vm0, %v1921_v56, 0.0 }
 0x4d9   :  { %v2066_v13 = vadd.f32 %v2065_v27, %v2064_v12 }
 0x4da   :  { %v1939_v23 = vadd.f32 %v1938_v2, %v1918_v26  ;;  %v2038_v2 = vmax.f32 %v3892_v17, %v3703_v44 }
 0x4db   :  { %v1986_v48 = vpop.permute.xlu0 %1985 }
 0x4dc   :  { %v2006_v5 = vsel %vm112_vm0, %v3675_v57, %v1986_v48  ;;  %v1863_v50 = vpop.permute.xlu1 %1862  ;;  %v1940_v57 = vsel %vm112_vm0, %v1919_v21, 0.0  ;;  %v2034_v9 = vmax.f32 %v3889_v42, %v1986_v48  ;;  %v2054_v21 = vmul.f32 %v2038_v2, %v3762_v51 }
 0x4dd   :  { %v1873_v59 = vsel %vm112_vm0, %v1863_v50, %v1865_v36  ;;  %v2033_v41 = vmax.f32 %v3887_v52, %v2006_v5  ;;  %v1941_v53 = vadd.f32 %v1940_v57, %v1939_v23  ;;  %v3895_v23 = vmax.f32 %v3585_v34, 0.0 }
 0x4de   :  { %v1904_v16 = vmax.f32 %v3888_v35, %v1873_v59  ;;  %v2050_v62 = vmul.f32 %v2034_v9, %v3711_v10  ;;  %v2074_v11 = vsel %vm112_vm0, %v2054_v21, 0.0  ;;  %v3897_v35 = vmax.f32 %v3621_v7, 0.0 }
 0x4df   :  { %v2049_v46 = vmul.f32 %v2033_v41, %v3701_v18  ;;  %v3891_v18 = vmax.f32 %v3588_v58, 0.0 }
 0x4e0   :  { %v1920_v30 = vmul.f32 %v1904_v16, %v1816_v22  ;;  %v2068_v29 = vsel %vm112_vm0, %v2050_v62, 0.0 }
 0x4e1   :  { %v2067_v39 = vadd.f32 %v2066_v13, %v2049_v46 }
 0x4e2   :  { %v1942_v14 = vadd.f32 %v1941_v53, %v1920_v30 }
 0x4e3   :  { %v1988_v33 = vpop.permute.xlu0 %1987  ;;  %v2069_v63 = vadd.f32 %v2068_v29, %v2067_v39 }
 0x4e4   :  { %v1990_v8 = vpop.permute.xlu1 %1989  ;;  %v1944_v25 = vadd.f32 %v1943_v24, %v1942_v14 }
 0x4e5   :  { %v2007_v54 = vsel %vm112_vm0, %v1988_v33, %v1990_v8  ;;  %v2036_v36 = vmax.f32 %v3891_v18, %v1990_v8 }
 0x4e6   :  { %v2035_v61 = vmax.f32 %v3890_v55, %v2007_v54  ;;  %1945 = vadd.xlane.f32.xlu2 %v1944_v25 }
 0x4e7   :  { %v2052_v10 = vmul.f32 %v2036_v36, %v3728_v15 }
 0x4e8   :  { %v2051_v26 = vmul.f32 %v2035_v61, %v3721_v4  ;;  %v3893_v4 = vmax.f32 %v3607_v19, 0.0 }
 0x4e9   :  { %v2071_v48 = vsel %vm112_vm0, %v2052_v10, 0.0 }
 0x4ea   :  { %v2070_v40 = vadd.f32 %v2069_v63, %v2051_v26 }
 0x4eb   :  { %v1998_v28 = vpop.permute.xlu0 %1997 }
 0x4ec   :  { %v1992_v3 = vpop.permute.xlu1 %1991  ;;  %v2009_v38 = vsel %vm112_vm0, %v3739_v1, %v1998_v28  ;;  %v2040_v32 = vmax.f32 %v3894_v20, %v1998_v28  ;;  %v2072_v15 = vadd.f32 %v2071_v48, %v2070_v40 }
 0x4ed   :  { %v2008_v58 = vsel %vm112_vm0, %v1992_v3, %v3703_v44  ;;  %v2039_v5 = vmax.f32 %v3895_v23, %v2009_v38 }
 0x4ee   :  { %v2037_v47 = vmax.f32 %v3893_v4, %v2008_v58  ;;  %v2056_v44 = vmul.f32 %v2040_v32, %v1815_v6 }
 0x4ef   :  { %v2055_v19 = vmul.f32 %v2039_v5, %v3772_v43 }
 0x4f0   :  { %v2053_v50 = vmul.f32 %v2037_v47, %v3746_v60  ;;  %v2077_v60 = vsel %vm112_vm0, %v2056_v44, 0.0 }
 0x4f2   :  { %v2073_v1 = vadd.f32 %v2072_v15, %v2053_v50 }
 0x4f3   :  { %v2000_v59 = vpop.permute.xlu0 %1999 }
 0x4f4   :  { %v2075_v49 = vadd.f32 %v2074_v11, %v2073_v1  ;;  %v2002_v51 = vpop.permute.xlu1 %2001 }
 0x4f5   :  { %v2010_v52 = vsel %vm112_vm0, %v2000_v59, %v2002_v51  ;;  %v2042_v41 = vmax.f32 %v3896_v0, %v2002_v51 }
 0x4f6   :  { %v2041_v34 = vmax.f32 %v3897_v35, %v2010_v52  ;;  %v2076_v16 = vadd.f32 %v2075_v49, %v2055_v19 }
 0x4f7   :  { %v2058_v31 = vmul.f32 %v2042_v41, %v1817_v45 }
 0x4f8   :  { %v2057_v56 = vmul.f32 %v2041_v34, %v1816_v22  ;;  %v2078_v57 = vadd.f32 %v2077_v60, %v2076_v16 }
 0x4f9   :  { %v2080_v12 = vsel %vm112_vm0, %v2058_v31, 0.0  ;;  %vm2100_vm0 = vcmask 8192  }
 0x4fa   :  { %v2079_v6 = vadd.f32 %v2078_v57, %v2057_v56 }
 0x4fc   :  { %v2081_v43 = vadd.f32 %v2080_v12, %v2079_v6  ;;  %v2097_v62 = vpop.permute.xlu1 %2096 }
 0x4fe   :  { %2082 = vadd.xlane.f32.xlu0 %v2081_v43 }
 0x559   :  { %v1946_v53 = vpop.xlane.xlu2 %1945 }
 0x55a   :  { %v1947_v30 = vrot.slane %v1946_v53, 4 }
 0x55c   :  { %v1948_v42 = vadd.f32 %v1947_v30, %v1946_v53 }
 0x55e   :  { %v1949_v9 = vrot.slane %v1948_v42, 2 }
 0x560   :  { %v1950_v37 = vadd.f32 %v1949_v9, %v1948_v42 }
 0x562   :  { %v1951_v46 = vrot.slane %v1950_v37, 1 }
 0x564   :  { %v1952_v14 = vadd.f32 %v1951_v46, %v1950_v37 }
 0x566   :  { %2426 = vpush %v1952_v14 }
 0x571   :  { %v2083_v7 = vpop.xlane.xlu0 %2082 }
 0x572   :  { %v2084_v27 = vrot.slane %v2083_v7, 4 }
 0x574   :  { %v2085_v33 = vadd.f32 %v2084_v27, %v2083_v7 }
 0x576   :  { %v2086_v24 = vrot.slane %v2085_v33, 2 }
 0x578   :  { %v2087_v45 = vadd.f32 %v2086_v24, %v2085_v33 }
 0x57a   :  { %v2088_v22 = vrot.slane %v2087_v45, 1 }
 0x57c   :  { %v2089_v13 = vadd.f32 %v2088_v22, %v2087_v45 }
 0x57e   :  { %2428 = vpush %v2089_v13 }
 0x597   :  { %s2427_s4 = spop %2426 }
 0x598   :  { %v1954_v8 = vstv %s2427_s4 }
 0x5af   :  { %s2429_s8 = spop %2428 }
 0x5b0   :  { %v2091_v25 = vstv %s2429_s8 }
 0x5b1   :  { %v2093_v54 = vsel %vm832_vm13, %v1954_v8, %v2091_v25 }
 0x5b2   :  { %v2099_v39 = vadd.f32 %v2097_v62, %v2093_v54 }
 0x5b4   :  { %2101 = vst.msk [vmem:[#allocation4] sm:$0x1] %vm2100_vm0, %v2099_v39 }
 0x5b5   :  { %2112 = dma.vmem_to_hbm [thread:$0]  %s2108_s28, 16, %s2110_s7, [#allocation5]  }
 0x5b6   :  { %2467 = dma.done.wait [#allocation5], 16  }
 0x5b7   :  { %2468 = vsyncadd [#allocation5], 4294967280 }
 0x5b8   :  { %2117 = vsyncpa [#allocation5], 1 }

</bundles_post_ra>
